<compile_context>
chip_gen: v5e
topology: v5e:2x2
jax: 0.10.0
libtpu: 0.0.40
codegen_flags: <defaults>
</compile_context>

<pallas_src>
import functools

import jax
import jax.numpy as jnp
from jax.experimental import pallas as pl
from jax.experimental.pallas import tpu as pltpu

BN_EPS = 1e-5
LANES = 128
SUBLANES = 8


def _round_up(a, b):
    return (a + b - 1) // b * b


def _tiling(m, block_m):
    # bf16 packs 2 rows per sublane -> keep the M tile a multiple of 16.
    bm = _round_up(min(block_m, _round_up(m, 16)), 16)
    return bm, _round_up(m, bm)


def _vmem_limit(step_bytes):
    """Scoped-VMEM request: double-buffered per-step working set + headroom,
    clamped so it raises the small defaults on v5e/v6e (128 MiB physical) but
    leaves ~16 MiB free out of v7x's 64 MiB physical VMEM per TensorCore."""
    want = 2 * step_bytes + (8 << 20)
    return int(max(32 << 20, min(48 << 20, want)))


# ----------------------------- Pallas kernels -----------------------------

def _mm_stats_kernel(*args, n_mm):
    """Pass 1: y_t = p_t @ w_t; store y_t (bf16) and per-tile channel stats.

    args = [p_0, w_0, ..., p_{n-1}, w_{n-1},
            y_0, sum_0, ssq_0, ..., y_{n-1}, sum_{n-1}, ssq_{n-1}]
    Every output is tiled by the grid index, so grid steps are independent
    ("parallel"; v7x can shard them across its two TensorCores).  Zero-padded
    M rows / K columns contribute 0 to y and to both sums.
    """
    ins, outs = args[:2 * n_mm], args[2 * n_mm:]
    for t in range(n_mm):
        p_ref, w_ref = ins[2 * t], ins[2 * t + 1]
        y_ref, sum_ref, ssq_ref = outs[3 * t], outs[3 * t + 1], outs[3 * t + 2]
        y = jnp.dot(p_ref[...], w_ref[...], preferred_element_type=jnp.float32)
        y_ref[...] = y.astype(y_ref.dtype)
        s = jnp.sum(y, axis=0, keepdims=True)          # (1, C) f32
        q = jnp.sum(y * y, axis=0, keepdims=True)
        # Partial-stat blocks are (1, 8, C) to keep the store (8,128)-aligned;
        # broadcast across the 8 sublanes, row 0 is read back outside.
        sum_ref[...] = jnp.broadcast_to(s.reshape(1, 1, -1), sum_ref.shape)
        ssq_ref[...] = jnp.broadcast_to(q.reshape(1, 1, -1), ssq_ref.shape)


def _apply_kernel(*args, n_mm, has_residual):
    """Pass 2: out = relu( sum_t y_t * scale_t + shift [+ residual] ).

    args = [y_0, scale_0, ..., y_{n-1}, scale_{n-1}, shift, [residual], out]
    y / residual stream as bf16; all affine math in f32; bf16 lane-dense store.
    """
    n_in = 2 * n_mm + 1 + (1 if has_residual else 0)
    ins, o_ref = args[:n_in], args[n_in]
    acc = ins[2 * n_mm][...]                                    # shift (1, C) f32
    for t in range(n_mm):
        acc = acc + ins[2 * t][...].astype(jnp.float32) * ins[2 * t + 1][...]
    if has_residual:
        acc = acc + ins[2 * n_mm + 1][...].astype(jnp.float32)
    o_ref[...] = jnp.maximum(acc, 0.0).astype(o_ref.dtype)


# ----------------- fused conv + BN (+ shortcut) + ReLU pipeline -----------------

def fused_conv_bn_relu(terms, residual, m_true, m_pad, bm, out_c):
    """relu( sum_t BN_t(patches_t @ weight_t)  [+ residual] ) over M rows.

    terms: list of (patches (m_pad, k_pad) bf16, zero-padded,
                    weight (K_t, out_c) f32, gamma (1, out_c), beta (1, out_c))
    residual: optional (m_pad, c_pad) bf16 added before the final ReLU.
    BN_t is training-mode BatchNorm (batch stats over m_true rows, biased var).
    Returns (m_pad, c_pad) bf16; the caller slices [:m_true, :out_c].
    """
    n_mm = len(terms)
    c_pad = _round_up(out_c, LANES)
    grid_m = m_pad // bm
    grid = (grid_m,)

    def tile_spec(width):                        # M-tiled (streamed) operand
        return pl.BlockSpec((bm, width), lambda i: (i, 0))

    def invariant_spec(shape):                   # grid-invariant operand
        return pl.BlockSpec(shape, lambda i: tuple(0 for _ in shape))

    # -- pack weights / BN params (tiny); patch matrices arrive pre-padded bf16 --
    packed, mm_flops, p1_bytes = [], 0, 0
    for (p_p, w, g, b) in terms:
        k_pad = p_p.shape[1]
        k = w.shape[0]
        w_p = jnp.pad(w.astype(jnp.float32),
                      ((0, k_pad - k), (0, c_pad - out_c))).astype(jnp.bfloat16)
        g_p = jnp.pad(g.astype(jnp.float32).reshape(1, -1),
                      ((0, 0), (0, c_pad - out_c)))
        b_p = jnp.pad(b.astype(jnp.float32).reshape(1, -1),
                      ((0, 0), (0, c_pad - out_c)))
        packed.append((p_p, w_p, g_p, b_p, k_pad))
        mm_flops += 2 * m_pad * k_pad * c_pad
        p1_bytes += (p_p.size + w_p.size + m_pad * c_pad) * 2 \
            + 2 * grid_m * SUBLANES * c_pad * 4

    # -------- pass 1: matmul -> y (bf16) + per-tile channel sum / ssq --------
    p1_inputs, p1_in_specs, p1_out_shapes, p1_out_specs = [], [], [], []
    p1_step = 0
    for (p_p, w_p, _, _, k_pad) in packed:
        p1_inputs += [p_p, w_p]
        p1_in_specs += [tile_spec(k_pad), invariant_spec((k_pad, c_pad))]
        p1_out_shapes += [
            jax.ShapeDtypeStruct((m_pad, c_pad), jnp.bfloat16),
            jax.ShapeDtypeStruct((grid_m, SUBLANES, c_pad), jnp.float32),
            jax.ShapeDtypeStruct((grid_m, SUBLANES, c_pad), jnp.float32)]
        p1_out_specs += [
            pl.BlockSpec((bm, c_pad), lambda i: (i, 0)),
            pl.BlockSpec((1, SUBLANES, c_pad), lambda i: (i, 0, 0)),
            pl.BlockSpec((1, SUBLANES, c_pad), lambda i: (i, 0, 0))]
        p1_step += (bm * k_pad + k_pad * c_pad + bm * c_pad) * 2 \
            + 2 * SUBLANES * c_pad * 4

    pass1 = pl.pallas_call(
        functools.partial(_mm_stats_kernel, n_mm=n_mm),
        grid=grid,
        in_specs=p1_in_specs,
        out_specs=p1_out_specs,
        out_shape=p1_out_shapes,
        compiler_params=pltpu.CompilerParams(
            dimension_semantics=("parallel",),
            vmem_limit_bytes=_vmem_limit(p1_step)),
        cost_estimate=pl.CostEstimate(
            flops=mm_flops, transcendentals=0, bytes_accessed=p1_bytes),
    )(*p1_inputs)

    # ---- between passes: fold BN into per-channel scale / combined shift ----
    inv_m = 1.0 / m_true
    scales = []
    shift = jnp.zeros((1, c_pad), jnp.float32)
    for t, (_, _, g_p, b_p, _) in enumerate(packed):
        psum, pssq = pass1[3 * t + 1], pass1[3 * t + 2]
        s = jnp.sum(psum[:, 0, :], axis=0, keepdims=True)       # (1, c_pad)
        q = jnp.sum(pssq[:, 0, :], axis=0, keepdims=True)
        mean = s * inv_m
        var = jnp.maximum(q * inv_m - mean * mean, 0.0)         # guard cancellation
        scale = g_p * jax.lax.rsqrt(var + BN_EPS)
        shift = shift + (b_p - mean * scale)
        scales.append(scale)

    # ------ pass 2: sum_t y*scale + shift (+ residual), ReLU, bf16 store ------
    has_residual = residual is not None
    p2_inputs, p2_in_specs = [], []
    for t in range(n_mm):
        p2_inputs += [pass1[3 * t], scales[t]]
        p2_in_specs += [tile_spec(c_pad), invariant_spec((1, c_pad))]
    p2_inputs.append(shift)
    p2_in_specs.append(invariant_spec((1, c_pad)))
    if has_residual:
        p2_inputs.append(residual)
        p2_in_specs.append(tile_spec(c_pad))

    n_stream = n_mm + 1 + (1 if has_residual else 0)            # y's + out (+ res)
    p2_step = n_stream * bm * c_pad * 2 + (n_mm + 1) * c_pad * 4
    p2_bytes = n_stream * m_pad * c_pad * 2 + (n_mm + 1) * c_pad * 4

    out = pl.pallas_call(
        functools.partial(_apply_kernel, n_mm=n_mm, has_residual=has_residual),
        grid=grid,
        in_specs=p2_in_specs,
        out_specs=pl.BlockSpec((bm, c_pad), lambda i: (i, 0)),
        out_shape=jax.ShapeDtypeStruct((m_pad, c_pad), jnp.bfloat16),
        compiler_params=pltpu.CompilerParams(
            dimension_semantics=("parallel",),
            vmem_limit_bytes=_vmem_limit(p2_step)),
        cost_estimate=pl.CostEstimate(
            flops=(2 * n_mm + 2) * m_pad * c_pad,
            transcendentals=0,
            bytes_accessed=p2_bytes),
    )(*p2_inputs)

    return out


# ------------------- JAX glue (im2col, weight layout) -------------------

def im2col_3x3(x_nhwc, stride, m_pad):
    """3x3 / pad=1 conv patches of an (already bf16) NHWC tensor, materialized
    exactly once in bf16 and zero-padded to (m_pad, round_up(9*Cin, 128))."""
    N, H, W, C = x_nhwc.shape
    xp = jnp.pad(x_nhwc, ((0, 0), (1, 1), (1, 1), (0, 0)))
    Ho = (H + 2 - 3) // stride + 1
    Wo = (W + 2 - 3) // stride + 1
    taps = [xp[:, kh:kh + stride * Ho:stride, kw:kw + stride * Wo:stride, :]
            for kh in range(3) for kw in range(3)]
    p = jnp.concatenate(taps, axis=-1).reshape(N * Ho * Wo, 9 * C)  # (kh,kw,cin)
    k_pad = _round_up(9 * C, LANES)
    return jnp.pad(p, ((0, m_pad - N * Ho * Wo), (0, k_pad - 9 * C)))


def w3x3_to_mat(w_pt):
    """(Cout, Cin, 3, 3) PyTorch layout -> (9*Cin, Cout), matching im2col order."""
    return jnp.transpose(w_pt, (2, 3, 1, 0)).reshape(-1, w_pt.shape[0])


def w1x1_to_mat(w_pt):
    """(Cout, Cin, 1, 1) -> (Cin, Cout)."""
    return jnp.transpose(w_pt, (2, 3, 1, 0)).reshape(w_pt.shape[1], w_pt.shape[0])


def basic_block_forward(x_nchw, params, *, in_planes, planes, stride,
                        block_m=512):
    """Returns (out_nchw, [embedding1_nchw, embedding2_nchw]) in f32."""
    N, _, H, W = x_nchw.shape
    # NHWC + bf16 once: patches / residual / shortcut streams are bf16 from here.
    x = jnp.transpose(x_nchw, (0, 2, 3, 1)).astype(jnp.bfloat16)
    Ho = (H + 2 - 3) // stride + 1
    Wo = (W + 2 - 3) // stride + 1
    M = N * Ho * Wo
    bm, m_pad = _tiling(M, block_m)
    c_pad = _round_up(planes, LANES)

    # conv1 (3x3, stride) + bn1 + relu  -> embedding[0]
    p1 = im2col_3x3(x, stride, m_pad)
    out1 = fused_conv_bn_relu(
        [(p1, w3x3_to_mat(params["w1"]), params["g1"], params["b1"])],
        residual=None, m_true=M, m_pad=m_pad, bm=bm, out_c=planes)
    out1_nhwc = out1[:M, :planes].reshape(N, Ho, Wo, planes)           # bf16

    # conv2 (3x3, stride 1) + bn2 + shortcut + relu  -> embedding[1] == output
    p2 = im2col_3x3(out1_nhwc, 1, m_pad)
    terms = [(p2, w3x3_to_mat(params["w2"]), params["g2"], params["b2"])]
    if stride != 1 or in_planes != planes:
        # projection shortcut (1x1 conv + BN) fused as a second matmul term
        cin_pad = _round_up(in_planes, LANES)
        xsc = x[:, ::stride, ::stride, :].reshape(M, in_planes)
        xsc = jnp.pad(xsc, ((0, m_pad - M), (0, cin_pad - in_planes)))
        terms.append((xsc, w1x1_to_mat(params["wsc"]),
                      params["gsc"], params["bsc"]))
        residual = None
    else:
        residual = jnp.pad(x.reshape(M, planes),
                           ((0, m_pad - M), (0, c_pad - planes)))       # identity
    out2 = fused_conv_bn_relu(terms, residual=residual, m_true=M,
                              m_pad=m_pad, bm=bm, out_c=planes)
    out2_nhwc = out2[:M, :planes].reshape(N, Ho, Wo, planes)

    # Returned tensors in f32 (caller-facing); intermediates stayed bf16.
    out_nchw = jnp.transpose(out2_nhwc, (0, 3, 1, 2)).astype(jnp.float32)
    emb1_nchw = jnp.transpose(out1_nhwc, (0, 3, 1, 2)).astype(jnp.float32)
    return out_nchw, [emb1_nchw, out_nchw]


# --------------- pure-JAX f32 reference (for verification) ---------------

def _ref_conv(x_nhwc, w_pt, stride, padding):
    return jax.lax.conv_general_dilated(
        x_nhwc, jnp.transpose(w_pt, (2, 3, 1, 0)),
        window_strides=(stride, stride),
        padding=[(padding, padding), (padding, padding)],
        dimension_numbers=("NHWC", "HWIO", "NHWC"))


def _ref_bn(y, gamma, beta):
    mean = y.mean(axis=(0, 1, 2))
    var = y.var(axis=(0, 1, 2))  # biased, like torch BN train mode
    return (y - mean) / jnp.sqrt(var + BN_EPS) * gamma.reshape(-1) + beta.reshape(-1)


def reference_forward(x_nchw, params, *, in_planes, planes, stride):
    x = jnp.transpose(x_nchw, (0, 2, 3, 1)).astype(jnp.float32)
    out = jax.nn.relu(_ref_bn(_ref_conv(x, params["w1"], stride, 1),
                              params["g1"], params["b1"]))
    main = _ref_bn(_ref_conv(out, params["w2"], 1, 1), params["g2"], params["b2"])
    if stride != 1 or in_planes != planes:
        sc = _ref_bn(_ref_conv(x, params["wsc"], stride, 0),
                     params["gsc"], params["bsc"])
    else:
        sc = x
    return jnp.transpose(jax.nn.relu(main + sc), (0, 3, 1, 2))


# ----------------------------------- main -----------------------------------

if __name__ == "__main__":
    key = jax.random.PRNGKey(0)

    def make_params(k, in_planes, planes):
        ks = jax.random.split(k, 9)
        return {
            "w1": 0.1 * jax.random.normal(ks[0], (planes, in_planes, 3, 3), jnp.float32),
            "w2": 0.1 * jax.random.normal(ks[1], (planes, planes, 3, 3), jnp.float32),
            "wsc": 0.1 * jax.random.normal(ks[2], (planes, in_planes, 1, 1), jnp.float32),
            "g1": 1.0 + 0.1 * jax.random.normal(ks[3], (1, planes), jnp.float32),
            "b1": 0.1 * jax.random.normal(ks[4], (1, planes), jnp.float32),
            "g2": 1.0 + 0.1 * jax.random.normal(ks[5], (1, planes), jnp.float32),
            "b2": 0.1 * jax.random.normal(ks[6], (1, planes), jnp.float32),
            "gsc": 1.0 + 0.1 * jax.random.normal(ks[7], (1, planes), jnp.float32),
            "bsc": 0.1 * jax.random.normal(ks[8], (1, planes), jnp.float32),
        }

    # (in_planes, planes, H, W, stride):
    #   stride=2 exercises the fused projection shortcut (1x1 conv + BN);
    #   stride=1 exercises the identity shortcut and a multi-step M grid.
    configs = [(4, 8, 16, 16, 2), (8, 8, 16, 16, 1)]
    N = 2

    for in_planes, planes, H, W, stride in configs:
        kx, kp, key = jax.random.split(key, 3)
        x = jax.random.normal(kx, (N, in_planes, H, W), dtype=jnp.float32)
        params = make_params(kp, in_planes, planes)

        fwd = jax.jit(functools.partial(
            basic_block_forward, in_planes=in_planes, planes=planes,
            stride=stride, block_m=128))  # small tile -> multi-step grid at toy size
        out, embeddings = fwd(x, params)
        out = jax.block_until_ready(out)
        _ = [jax.block_until_ready(e) for e in embeddings]

        ref = jax.block_until_ready(reference_forward(
            x, params, in_planes=in_planes, planes=planes, stride=stride))

        assert out.shape == (N, planes, H // stride, W // stride), out.shape
        err = float(jnp.max(jnp.abs(out - ref)))
        # bf16 matmul operands + bf16 y / activation / residual round-trips
        # (with f32 accumulation and f32 BN math) vs a pure-f32 reference;
        # structural errors would be orders of magnitude larger than this.
        assert jnp.allclose(out, ref, rtol=5e-2, atol=5e-2), err

    print("KERNEL_OK")
</pallas_src>

<mosaic_0001>
module attributes {stable_mosaic.version = 11 : i64} {
  func.func @_mm_stats_kernel(%arg0: i32, %arg1: memref<128x128xbf16, #tpu.memory_space<vmem>>, %arg2: memref<128x128xbf16, #tpu.memory_space<vmem>>, %arg3: memref<128x128xbf16, #tpu.memory_space<vmem>>, %arg4: memref<1x8x128xf32, #tpu.memory_space<vmem>>, %arg5: memref<1x8x128xf32, #tpu.memory_space<vmem>>) attributes {dimension_semantics = [#tpu.dimension_semantics<parallel>], iteration_bounds = array<i64: 1>, scalar_prefetch = 0 : i64, scratch_operands = 0 : i64, tpu.core_type = #tpu.core_type<tc>, window_params = [{transform_indices = @transform_0, window_bounds = array<i64: 128, 128>}, {pipeline_mode = #tpu.pipeline_mode<synchronous>, transform_indices = @transform_1, window_bounds = array<i64: 128, 128>}, {transform_indices = @transform_2, window_bounds = array<i64: 128, 128>}, {transform_indices = @transform_3, window_bounds = array<i64: 1, 8, 128>}, {transform_indices = @transform_4, window_bounds = array<i64: 1, 8, 128>}]} {
    %c0 = arith.constant 0 : index
    %c0_0 = arith.constant 0 : index
    %0 = vector.load %arg1[%c0, %c0_0] : memref<128x128xbf16, #tpu.memory_space<vmem>>, vector<128x128xbf16>
    %c0_1 = arith.constant 0 : index
    %c0_2 = arith.constant 0 : index
    %1 = vector.load %arg2[%c0_1, %c0_2] : memref<128x128xbf16, #tpu.memory_space<vmem>>, vector<128x128xbf16>
    %cst = arith.constant dense<0.000000e+00> : vector<128x128xf32>
    %2 = tpu.matmul %0, %1, %cst {dimension_numbers = #tpu.dot_dimension_numbers<[1], [0], [0], [1], [0, 0, 1, 1], [], []>} : vector<128x128xbf16>, vector<128x128xbf16>, vector<128x128xf32> -> vector<128x128xf32>
    %3 = arith.truncf %2 : vector<128x128xf32> to vector<128x128xbf16>
    %c0_3 = arith.constant 0 : index
    %c0_4 = arith.constant 0 : index
    %4 = vector.load %arg3[%c0_3, %c0_4] : memref<128x128xbf16, #tpu.memory_space<vmem>>, vector<128x128xbf16>
    tpu.vector_store %arg3[%c0_3, %c0_4], %3 {strides = array<i32>} : memref<128x128xbf16, #tpu.memory_space<vmem>>, vector<128x128xbf16>,
    %cst_5 = arith.constant dense<0.000000e+00> : vector<128xf32>
    %5 = vector.multi_reduction <add>, %2, %cst_5 [0] : vector<128x128xf32> to vector<128xf32>
    %6 = vector.shape_cast %5 : vector<128xf32> to vector<1x128xf32>
    %7 = arith.mulf %2, %2 : vector<128x128xf32>
    %cst_6 = arith.constant dense<0.000000e+00> : vector<128xf32>
    %8 = vector.multi_reduction <add>, %7, %cst_6 [0] : vector<128x128xf32> to vector<128xf32>
    %9 = vector.shape_cast %8 : vector<128xf32> to vector<1x128xf32>
    %10 = vector.shape_cast %6 : vector<1x128xf32> to vector<1x1x128xf32>
    %11 = vector.shape_cast %10 : vector<1x1x128xf32> to vector<1x1x128xf32>
    %12 = vector.broadcast %11 : vector<1x1x128xf32> to vector<1x8x128xf32>
    %c0_7 = arith.constant 0 : index
    %c0_8 = arith.constant 0 : index
    %c0_9 = arith.constant 0 : index
    %13 = vector.load %arg4[%c0_7, %c0_8, %c0_9] : memref<1x8x128xf32, #tpu.memory_space<vmem>>, vector<1x8x128xf32>
    tpu.vector_store %arg4[%c0_7, %c0_8, %c0_9], %12 {strides = array<i32>} : memref<1x8x128xf32, #tpu.memory_space<vmem>>, vector<1x8x128xf32>,
    %14 = vector.shape_cast %9 : vector<1x128xf32> to vector<1x1x128xf32>
    %15 = vector.shape_cast %14 : vector<1x1x128xf32> to vector<1x1x128xf32>
    %16 = vector.broadcast %15 : vector<1x1x128xf32> to vector<1x8x128xf32>
    %c0_10 = arith.constant 0 : index
    %c0_11 = arith.constant 0 : index
    %c0_12 = arith.constant 0 : index
    %17 = vector.load %arg5[%c0_10, %c0_11, %c0_12] : memref<1x8x128xf32, #tpu.memory_space<vmem>>, vector<1x8x128xf32>
    tpu.vector_store %arg5[%c0_10, %c0_11, %c0_12], %16 {strides = array<i32>} : memref<1x8x128xf32, #tpu.memory_space<vmem>>, vector<1x8x128xf32>,
    return
  }
  func.func @transform_0(%arg0: i32) -> (i32, i32) {
    %c0_i32 = arith.constant 0 : i32
    %c0_i32_0 = arith.constant 0 : i32
    return %arg0, %c0_i32 : i32, i32
  }
  func.func @transform_1(%arg0: i32) -> (i32, i32) {
    %c0_i32 = arith.constant 0 : i32
    %c0_i32_0 = arith.constant 0 : i32
    %c0_i32_1 = arith.constant 0 : i32
    return %c0_i32, %c0_i32_0 : i32, i32
  }
  func.func @transform_2(%arg0: i32) -> (i32, i32) {
    %c0_i32 = arith.constant 0 : i32
    %c0_i32_0 = arith.constant 0 : i32
    return %arg0, %c0_i32 : i32, i32
  }
  func.func @transform_3(%arg0: i32) -> (i32, i32, i32) {
    %c0_i32 = arith.constant 0 : i32
    %c0_i32_0 = arith.constant 0 : i32
    %c0_i32_1 = arith.constant 0 : i32
    return %arg0, %c0_i32, %c0_i32_0 : i32, i32, i32
  }
  func.func @transform_4(%arg0: i32) -> (i32, i32, i32) {
    %c0_i32 = arith.constant 0 : i32
    %c0_i32_0 = arith.constant 0 : i32
    %c0_i32_1 = arith.constant 0 : i32
    return %arg0, %c0_i32, %c0_i32_0 : i32, i32, i32
  }
}

module attributes {stable_mosaic.version = 11 : i64} {
  func.func @_apply_kernel(%arg0: i32, %arg1: memref<128x128xbf16, #tpu.memory_space<vmem>>, %arg2: memref<1x128xf32, #tpu.memory_space<vmem>>, %arg3: memref<1x128xf32, #tpu.memory_space<vmem>>, %arg4: memref<128x128xbf16, #tpu.memory_space<vmem>>) attributes {dimension_semantics = [#tpu.dimension_semantics<parallel>], iteration_bounds = array<i64: 1>, scalar_prefetch = 0 : i64, scratch_operands = 0 : i64, tpu.core_type = #tpu.core_type<tc>, window_params = [{transform_indices = @transform_0, window_bounds = array<i64: 128, 128>}, {pipeline_mode = #tpu.pipeline_mode<synchronous>, transform_indices = @transform_1, window_bounds = array<i64: 1, 128>}, {pipeline_mode = #tpu.pipeline_mode<synchronous>, transform_indices = @transform_2, window_bounds = array<i64: 1, 128>}, {transform_indices = @transform_3, window_bounds = array<i64: 128, 128>}]} {
    %c0 = arith.constant 0 : index
    %c0_0 = arith.constant 0 : index
    %0 = vector.load %arg3[%c0, %c0_0] : memref<1x128xf32, #tpu.memory_space<vmem>>, vector<1x128xf32>
    %c0_1 = arith.constant 0 : index
    %c0_2 = arith.constant 0 : index
    %1 = vector.load %arg1[%c0_1, %c0_2] : memref<128x128xbf16, #tpu.memory_space<vmem>>, vector<128x128xbf16>
    %2 = arith.extf %1 : vector<128x128xbf16> to vector<128x128xf32>
    %c0_3 = arith.constant 0 : index
    %c0_4 = arith.constant 0 : index
    %3 = vector.load %arg2[%c0_3, %c0_4] : memref<1x128xf32, #tpu.memory_space<vmem>>, vector<1x128xf32>
    %4 = vector.broadcast %3 : vector<1x128xf32> to vector<128x128xf32>
    %5 = arith.mulf %2, %4 : vector<128x128xf32>
    %6 = vector.broadcast %0 : vector<1x128xf32> to vector<128x128xf32>
    %7 = arith.addf %6, %5 : vector<128x128xf32>
    %cst = arith.constant 0.000000e+00 : f32
    %8 = vector.broadcast %cst : f32 to vector<128x128xf32>
    %9 = arith.maximumf %7, %8 : vector<128x128xf32>
    %10 = arith.truncf %9 : vector<128x128xf32> to vector<128x128xbf16>
    %c0_5 = arith.constant 0 : index
    %c0_6 = arith.constant 0 : index
    %11 = vector.load %arg4[%c0_5, %c0_6] : memref<128x128xbf16, #tpu.memory_space<vmem>>, vector<128x128xbf16>
    tpu.vector_store %arg4[%c0_5, %c0_6], %10 {strides = array<i32>} : memref<128x128xbf16, #tpu.memory_space<vmem>>, vector<128x128xbf16>,
    return
  }
  func.func @transform_0(%arg0: i32) -> (i32, i32) {
    %c0_i32 = arith.constant 0 : i32
    %c0_i32_0 = arith.constant 0 : i32
    return %arg0, %c0_i32 : i32, i32
  }
  func.func @transform_1(%arg0: i32) -> (i32, i32) {
    %c0_i32 = arith.constant 0 : i32
    %c0_i32_0 = arith.constant 0 : i32
    %c0_i32_1 = arith.constant 0 : i32
    return %c0_i32, %c0_i32_0 : i32, i32
  }
  func.func @transform_2(%arg0: i32) -> (i32, i32) {
    %c0_i32 = arith.constant 0 : i32
    %c0_i32_0 = arith.constant 0 : i32
    %c0_i32_1 = arith.constant 0 : i32
    return %c0_i32, %c0_i32_0 : i32, i32
  }
  func.func @transform_3(%arg0: i32) -> (i32, i32) {
    %c0_i32 = arith.constant 0 : i32
    %c0_i32_0 = arith.constant 0 : i32
    return %arg0, %c0_i32 : i32, i32
  }
}

module attributes {stable_mosaic.version = 11 : i64} {
  func.func @_mm_stats_kernel(%arg0: i32, %arg1: memref<128x128xbf16, #tpu.memory_space<vmem>>, %arg2: memref<128x128xbf16, #tpu.memory_space<vmem>>, %arg3: memref<128x128xbf16, #tpu.memory_space<vmem>>, %arg4: memref<128x128xbf16, #tpu.memory_space<vmem>>, %arg5: memref<128x128xbf16, #tpu.memory_space<vmem>>, %arg6: memref<1x8x128xf32, #tpu.memory_space<vmem>>, %arg7: memref<1x8x128xf32, #tpu.memory_space<vmem>>, %arg8: memref<128x128xbf16, #tpu.memory_space<vmem>>, %arg9: memref<1x8x128xf32, #tpu.memory_space<vmem>>, %arg10: memref<1x8x128xf32, #tpu.memory_space<vmem>>) attributes {dimension_semantics = [#tpu.dimension_semantics<parallel>], iteration_bounds = array<i64: 1>, scalar_prefetch = 0 : i64, scratch_operands = 0 : i64, tpu.core_type = #tpu.core_type<tc>, window_params = [{transform_indices = @transform_0, window_bounds = array<i64: 128, 128>}, {pipeline_mode = #tpu.pipeline_mode<synchronous>, transform_indices = @transform_1, window_bounds = array<i64: 128, 128>}, {transform_indices = @transform_2, window_bounds = array<i64: 128, 128>}, {pipeline_mode = #tpu.pipeline_mode<synchronous>, transform_indices = @transform_3, window_bounds = array<i64: 128, 128>}, {transform_indices = @transform_4, window_bounds = array<i64: 128, 128>}, {transform_indices = @transform_5, window_bounds = array<i64: 1, 8, 128>}, {transform_indices = @transform_6, window_bounds = array<i64: 1, 8, 128>}, {transform_indices = @transform_7, window_bounds = array<i64: 128, 128>}, {transform_indices = @transform_8, window_bounds = array<i64: 1, 8, 128>}, {transform_indices = @transform_9, window_bounds = array<i64: 1, 8, 128>}]} {
    %c0 = arith.constant 0 : index
    %c0_0 = arith.constant 0 : index
    %0 = vector.load %arg1[%c0, %c0_0] : memref<128x128xbf16, #tpu.memory_space<vmem>>, vector<128x128xbf16>
    %c0_1 = arith.constant 0 : index
    %c0_2 = arith.constant 0 : index
    %1 = vector.load %arg2[%c0_1, %c0_2] : memref<128x128xbf16, #tpu.memory_space<vmem>>, vector<128x128xbf16>
    %cst = arith.constant dense<0.000000e+00> : vector<128x128xf32>
    %2 = tpu.matmul %0, %1, %cst {dimension_numbers = #tpu.dot_dimension_numbers<[1], [0], [0], [1], [0, 0, 1, 1], [], []>} : vector<128x128xbf16>, vector<128x128xbf16>, vector<128x128xf32> -> vector<128x128xf32>
    %3 = arith.truncf %2 : vector<128x128xf32> to vector<128x128xbf16>
    %c0_3 = arith.constant 0 : index
    %c0_4 = arith.constant 0 : index
    %4 = vector.load %arg5[%c0_3, %c0_4] : memref<128x128xbf16, #tpu.memory_space<vmem>>, vector<128x128xbf16>
    tpu.vector_store %arg5[%c0_3, %c0_4], %3 {strides = array<i32>} : memref<128x128xbf16, #tpu.memory_space<vmem>>, vector<128x128xbf16>,
    %cst_5 = arith.constant dense<0.000000e+00> : vector<128xf32>
    %5 = vector.multi_reduction <add>, %2, %cst_5 [0] : vector<128x128xf32> to vector<128xf32>
    %6 = vector.shape_cast %5 : vector<128xf32> to vector<1x128xf32>
    %7 = arith.mulf %2, %2 : vector<128x128xf32>
    %cst_6 = arith.constant dense<0.000000e+00> : vector<128xf32>
    %8 = vector.multi_reduction <add>, %7, %cst_6 [0] : vector<128x128xf32> to vector<128xf32>
    %9 = vector.shape_cast %8 : vector<128xf32> to vector<1x128xf32>
    %10 = vector.shape_cast %6 : vector<1x128xf32> to vector<1x1x128xf32>
    %11 = vector.shape_cast %10 : vector<1x1x128xf32> to vector<1x1x128xf32>
    %12 = vector.broadcast %11 : vector<1x1x128xf32> to vector<1x8x128xf32>
    %c0_7 = arith.constant 0 : index
    %c0_8 = arith.constant 0 : index
    %c0_9 = arith.constant 0 : index
    %13 = vector.load %arg6[%c0_7, %c0_8, %c0_9] : memref<1x8x128xf32, #tpu.memory_space<vmem>>, vector<1x8x128xf32>
    tpu.vector_store %arg6[%c0_7, %c0_8, %c0_9], %12 {strides = array<i32>} : memref<1x8x128xf32, #tpu.memory_space<vmem>>, vector<1x8x128xf32>,
    %14 = vector.shape_cast %9 : vector<1x128xf32> to vector<1x1x128xf32>
    %15 = vector.shape_cast %14 : vector<1x1x128xf32> to vector<1x1x128xf32>
    %16 = vector.broadcast %15 : vector<1x1x128xf32> to vector<1x8x128xf32>
    %c0_10 = arith.constant 0 : index
    %c0_11 = arith.constant 0 : index
    %c0_12 = arith.constant 0 : index
    %17 = vector.load %arg7[%c0_10, %c0_11, %c0_12] : memref<1x8x128xf32, #tpu.memory_space<vmem>>, vector<1x8x128xf32>
    tpu.vector_store %arg7[%c0_10, %c0_11, %c0_12], %16 {strides = array<i32>} : memref<1x8x128xf32, #tpu.memory_space<vmem>>, vector<1x8x128xf32>,
    %c0_13 = arith.constant 0 : index
    %c0_14 = arith.constant 0 : index
    %18 = vector.load %arg3[%c0_13, %c0_14] : memref<128x128xbf16, #tpu.memory_space<vmem>>, vector<128x128xbf16>
    %c0_15 = arith.constant 0 : index
    %c0_16 = arith.constant 0 : index
    %19 = vector.load %arg4[%c0_15, %c0_16] : memref<128x128xbf16, #tpu.memory_space<vmem>>, vector<128x128xbf16>
    %cst_17 = arith.constant dense<0.000000e+00> : vector<128x128xf32>
    %20 = tpu.matmul %18, %19, %cst_17 {dimension_numbers = #tpu.dot_dimension_numbers<[1], [0], [0], [1], [0, 0, 1, 1], [], []>} : vector<128x128xbf16>, vector<128x128xbf16>, vector<128x128xf32> -> vector<128x128xf32>
    %21 = arith.truncf %20 : vector<128x128xf32> to vector<128x128xbf16>
    %c0_18 = arith.constant 0 : index
    %c0_19 = arith.constant 0 : index
    %22 = vector.load %arg8[%c0_18, %c0_19] : memref<128x128xbf16, #tpu.memory_space<vmem>>, vector<128x128xbf16>
    tpu.vector_store %arg8[%c0_18, %c0_19], %21 {strides = array<i32>} : memref<128x128xbf16, #tpu.memory_space<vmem>>, vector<128x128xbf16>,
    %cst_20 = arith.constant dense<0.000000e+00> : vector<128xf32>
    %23 = vector.multi_reduction <add>, %20, %cst_20 [0] : vector<128x128xf32> to vector<128xf32>
    %24 = vector.shape_cast %23 : vector<128xf32> to vector<1x128xf32>
    %25 = arith.mulf %20, %20 : vector<128x128xf32>
    %cst_21 = arith.constant dense<0.000000e+00> : vector<128xf32>
    %26 = vector.multi_reduction <add>, %25, %cst_21 [0] : vector<128x128xf32> to vector<128xf32>
    %27 = vector.shape_cast %26 : vector<128xf32> to vector<1x128xf32>
    %28 = vector.shape_cast %24 : vector<1x128xf32> to vector<1x1x128xf32>
    %29 = vector.shape_cast %28 : vector<1x1x128xf32> to vector<1x1x128xf32>
    %30 = vector.broadcast %29 : vector<1x1x128xf32> to vector<1x8x128xf32>
    %c0_22 = arith.constant 0 : index
    %c0_23 = arith.constant 0 : index
    %c0_24 = arith.constant 0 : index
    %31 = vector.load %arg9[%c0_22, %c0_23, %c0_24] : memref<1x8x128xf32, #tpu.memory_space<vmem>>, vector<1x8x128xf32>
    tpu.vector_store %arg9[%c0_22, %c0_23, %c0_24], %30 {strides = array<i32>} : memref<1x8x128xf32, #tpu.memory_space<vmem>>, vector<1x8x128xf32>,
    %32 = vector.shape_cast %27 : vector<1x128xf32> to vector<1x1x128xf32>
    %33 = vector.shape_cast %32 : vector<1x1x128xf32> to vector<1x1x128xf32>
    %34 = vector.broadcast %33 : vector<1x1x128xf32> to vector<1x8x128xf32>
    %c0_25 = arith.constant 0 : index
    %c0_26 = arith.constant 0 : index
    %c0_27 = arith.constant 0 : index
    %35 = vector.load %arg10[%c0_25, %c0_26, %c0_27] : memref<1x8x128xf32, #tpu.memory_space<vmem>>, vector<1x8x128xf32>
    tpu.vector_store %arg10[%c0_25, %c0_26, %c0_27], %34 {strides = array<i32>} : memref<1x8x128xf32, #tpu.memory_space<vmem>>, vector<1x8x128xf32>,
    return
  }
  func.func @transform_0(%arg0: i32) -> (i32, i32) {
    %c0_i32 = arith.constant 0 : i32
    %c0_i32_0 = arith.constant 0 : i32
    return %arg0, %c0_i32 : i32, i32
  }
  func.func @transform_1(%arg0: i32) -> (i32, i32) {
    %c0_i32 = arith.constant 0 : i32
    %c0_i32_0 = arith.constant 0 : i32
    %c0_i32_1 = arith.constant 0 : i32
    return %c0_i32, %c0_i32_0 : i32, i32
  }
  func.func @transform_2(%arg0: i32) -> (i32, i32) {
    %c0_i32 = arith.constant 0 : i32
    %c0_i32_0 = arith.constant 0 : i32
    return %arg0, %c0_i32 : i32, i32
  }
  func.func @transform_3(%arg0: i32) -> (i32, i32) {
    %c0_i32 = arith.constant 0 : i32
    %c0_i32_0 = arith.constant 0 : i32
    %c0_i32_1 = arith.constant 0 : i32
    return %c0_i32, %c0_i32_0 : i32, i32
  }
  func.func @transform_4(%arg0: i32) -> (i32, i32) {
    %c0_i32 = arith.constant 0 : i32
    %c0_i32_0 = arith.constant 0 : i32
    return %arg0, %c0_i32 : i32, i32
  }
  func.func @transform_5(%arg0: i32) -> (i32, i32, i32) {
    %c0_i32 = arith.constant 0 : i32
    %c0_i32_0 = arith.constant 0 : i32
    %c0_i32_1 = arith.constant 0 : i32
    return %arg0, %c0_i32, %c0_i32_0 : i32, i32, i32
  }
  func.func @transform_6(%arg0: i32) -> (i32, i32, i32) {
    %c0_i32 = arith.constant 0 : i32
    %c0_i32_0 = arith.constant 0 : i32
    %c0_i32_1 = arith.constant 0 : i32
    return %arg0, %c0_i32, %c0_i32_0 : i32, i32, i32
  }
  func.func @transform_7(%arg0: i32) -> (i32, i32) {
    %c0_i32 = arith.constant 0 : i32
    %c0_i32_0 = arith.constant 0 : i32
    return %arg0, %c0_i32 : i32, i32
  }
  func.func @transform_8(%arg0: i32) -> (i32, i32, i32) {
    %c0_i32 = arith.constant 0 : i32
    %c0_i32_0 = arith.constant 0 : i32
    %c0_i32_1 = arith.constant 0 : i32
    return %arg0, %c0_i32, %c0_i32_0 : i32, i32, i32
  }
  func.func @transform_9(%arg0: i32) -> (i32, i32, i32) {
    %c0_i32 = arith.constant 0 : i32
    %c0_i32_0 = arith.constant 0 : i32
    %c0_i32_1 = arith.constant 0 : i32
    return %arg0, %c0_i32, %c0_i32_0 : i32, i32, i32
  }
}

module attributes {stable_mosaic.version = 11 : i64} {
  func.func @_apply_kernel(%arg0: i32, %arg1: memref<128x128xbf16, #tpu.memory_space<vmem>>, %arg2: memref<1x128xf32, #tpu.memory_space<vmem>>, %arg3: memref<128x128xbf16, #tpu.memory_space<vmem>>, %arg4: memref<1x128xf32, #tpu.memory_space<vmem>>, %arg5: memref<1x128xf32, #tpu.memory_space<vmem>>, %arg6: memref<128x128xbf16, #tpu.memory_space<vmem>>) attributes {dimension_semantics = [#tpu.dimension_semantics<parallel>], iteration_bounds = array<i64: 1>, scalar_prefetch = 0 : i64, scratch_operands = 0 : i64, tpu.core_type = #tpu.core_type<tc>, window_params = [{transform_indices = @transform_0, window_bounds = array<i64: 128, 128>}, {pipeline_mode = #tpu.pipeline_mode<synchronous>, transform_indices = @transform_1, window_bounds = array<i64: 1, 128>}, {transform_indices = @transform_2, window_bounds = array<i64: 128, 128>}, {pipeline_mode = #tpu.pipeline_mode<synchronous>, transform_indices = @transform_3, window_bounds = array<i64: 1, 128>}, {pipeline_mode = #tpu.pipeline_mode<synchronous>, transform_indices = @transform_4, window_bounds = array<i64: 1, 128>}, {transform_indices = @transform_5, window_bounds = array<i64: 128, 128>}]} {
    %c0 = arith.constant 0 : index
    %c0_0 = arith.constant 0 : index
    %0 = vector.load %arg5[%c0, %c0_0] : memref<1x128xf32, #tpu.memory_space<vmem>>, vector<1x128xf32>
    %c0_1 = arith.constant 0 : index
    %c0_2 = arith.constant 0 : index
    %1 = vector.load %arg1[%c0_1, %c0_2] : memref<128x128xbf16, #tpu.memory_space<vmem>>, vector<128x128xbf16>
    %2 = arith.extf %1 : vector<128x128xbf16> to vector<128x128xf32>
    %c0_3 = arith.constant 0 : index
    %c0_4 = arith.constant 0 : index
    %3 = vector.load %arg2[%c0_3, %c0_4] : memref<1x128xf32, #tpu.memory_space<vmem>>, vector<1x128xf32>
    %4 = vector.broadcast %3 : vector<1x128xf32> to vector<128x128xf32>
    %5 = arith.mulf %2, %4 : vector<128x128xf32>
    %6 = vector.broadcast %0 : vector<1x128xf32> to vector<128x128xf32>
    %7 = arith.addf %6, %5 : vector<128x128xf32>
    %c0_5 = arith.constant 0 : index
    %c0_6 = arith.constant 0 : index
    %8 = vector.load %arg3[%c0_5, %c0_6] : memref<128x128xbf16, #tpu.memory_space<vmem>>, vector<128x128xbf16>
    %9 = arith.extf %8 : vector<128x128xbf16> to vector<128x128xf32>
    %c0_7 = arith.constant 0 : index
    %c0_8 = arith.constant 0 : index
    %10 = vector.load %arg4[%c0_7, %c0_8] : memref<1x128xf32, #tpu.memory_space<vmem>>, vector<1x128xf32>
    %11 = vector.broadcast %10 : vector<1x128xf32> to vector<128x128xf32>
    %12 = arith.mulf %9, %11 : vector<128x128xf32>
    %13 = arith.addf %7, %12 : vector<128x128xf32>
    %cst = arith.constant 0.000000e+00 : f32
    %14 = vector.broadcast %cst : f32 to vector<128x128xf32>
    %15 = arith.maximumf %13, %14 : vector<128x128xf32>
    %16 = arith.truncf %15 : vector<128x128xf32> to vector<128x128xbf16>
    %c0_9 = arith.constant 0 : index
    %c0_10 = arith.constant 0 : index
    %17 = vector.load %arg6[%c0_9, %c0_10] : memref<128x128xbf16, #tpu.memory_space<vmem>>, vector<128x128xbf16>
    tpu.vector_store %arg6[%c0_9, %c0_10], %16 {strides = array<i32>} : memref<128x128xbf16, #tpu.memory_space<vmem>>, vector<128x128xbf16>,
    return
  }
  func.func @transform_0(%arg0: i32) -> (i32, i32) {
    %c0_i32 = arith.constant 0 : i32
    %c0_i32_0 = arith.constant 0 : i32
    return %arg0, %c0_i32 : i32, i32
  }
  func.func @transform_1(%arg0: i32) -> (i32, i32) {
    %c0_i32 = arith.constant 0 : i32
    %c0_i32_0 = arith.constant 0 : i32
    %c0_i32_1 = arith.constant 0 : i32
    return %c0_i32, %c0_i32_0 : i32, i32
  }
  func.func @transform_2(%arg0: i32) -> (i32, i32) {
    %c0_i32 = arith.constant 0 : i32
    %c0_i32_0 = arith.constant 0 : i32
    return %arg0, %c0_i32 : i32, i32
  }
  func.func @transform_3(%arg0: i32) -> (i32, i32) {
    %c0_i32 = arith.constant 0 : i32
    %c0_i32_0 = arith.constant 0 : i32
    %c0_i32_1 = arith.constant 0 : i32
    return %c0_i32, %c0_i32_0 : i32, i32
  }
  func.func @transform_4(%arg0: i32) -> (i32, i32) {
    %c0_i32 = arith.constant 0 : i32
    %c0_i32_0 = arith.constant 0 : i32
    %c0_i32_1 = arith.constant 0 : i32
    return %c0_i32, %c0_i32_0 : i32, i32
  }
  func.func @transform_5(%arg0: i32) -> (i32, i32) {
    %c0_i32 = arith.constant 0 : i32
    %c0_i32_0 = arith.constant 0 : i32
    return %arg0, %c0_i32 : i32, i32
  }
}

</mosaic_0001>

<bundles_post_ra>
// kernel: basic_block_forward.5
= control target key start
LH: loop header
LB: loop body
LE: loop exit
PB: predicated region body
PF: predicated region fallthrough
CT: control target
= control target key end

     0   :  { %s336_s0 = inlined_call_operand.vmem [shape: bf16[128,128], index: 0, kind: input, shape index: {}]   ;;  %s337_s1 = inlined_call_operand.vmem [shape: f32[1,128], index: 1, kind: input, shape index: {}]   ;;  %s338_s2 = inlined_call_operand.vmem [shape: f32[1,128], index: 2, kind: input, shape index: {}]   ;;  %s339_s3 = inlined_call_operand.vmem [shape: bf16[128,128], index: 3, kind: output, shape index: {}]  }
   0x1   :  { %v139_v0 = vld [vmem:[%s336_s0] sm:$0xff]   ;;  %v210_v5 = vld [vmem:[%s336_s0 + $0x8] sm:$0xff]   ;;  %v211_v8 = vld [vmem:[%s336_s0 + $0x10] sm:$0xff]  }
   0x2   :  { %v140_v1 = vunpack.c.l.bf16 %v139_v0  ;;  %v141_v2 = vunpack.c.h.bf16 %v139_v0  ;;  %v252_v3 = vld [vmem:[%s337_s1] ss:$0 sm:$0xff]  ;;  %v144_v6 = vunpack.c.l.bf16 %v210_v5  ;;  %v145_v7 = vunpack.c.h.bf16 %v210_v5  ;;  %v212_v9 = vld [vmem:[%s336_s0 + $0x18] sm:$0xff]   ;;  %v214_v35 = vld [vmem:[%s336_s0 + $0x28] sm:$0xff]  }
   0x3   :  { %v257_v4 = vld [vmem:[%s338_s2] ss:$0 sm:$0xff]  ;;  %v148_v12 = vunpack.c.l.bf16 %v211_v8  ;;  %v149_v13 = vunpack.c.h.bf16 %v211_v8  ;;  %v152_v16 = vunpack.c.l.bf16 %v212_v9  ;;  %v153_v17 = vunpack.c.h.bf16 %v212_v9  ;;  %v215_v40 = vld [vmem:[%s336_s0 + $0x30] sm:$0xff]   ;;  %v216_v45 = vld [vmem:[%s336_s0 + $0x38] sm:$0xff]  }
   0x4   :  { %v51_v10 = vmul.f32 %v252_v3, %v140_v1  ;;  %v52_v11 = vmul.f32 %v252_v3, %v141_v2  ;;  %v53_v14 = vmul.f32 %v252_v3, %v144_v6  ;;  %v54_v15 = vmul.f32 %v252_v3, %v145_v7  ;;  %v213_v26 = vld [vmem:[%s336_s0 + $0x20] sm:$0xff]  }
   0x5   :  { %v55_v20 = vmul.f32 %v252_v3, %v148_v12  ;;  %v56_v21 = vmul.f32 %v252_v3, %v149_v13  ;;  %v57_v24 = vmul.f32 %v252_v3, %v152_v16  ;;  %v58_v25 = vmul.f32 %v252_v3, %v153_v17 }
   0x6   :  { %v70_v18 = vadd.f32 %v257_v4, %v51_v10  ;;  %v71_v19 = vadd.f32 %v257_v4, %v52_v11  ;;  %v72_v22 = vadd.f32 %v257_v4, %v53_v14  ;;  %v73_v23 = vadd.f32 %v257_v4, %v54_v15 }
   0x7   :  { %v74_v29 = vadd.f32 %v257_v4, %v55_v20  ;;  %v75_v30 = vadd.f32 %v257_v4, %v56_v21  ;;  %v76_v33 = vadd.f32 %v257_v4, %v57_v24  ;;  %v77_v34 = vadd.f32 %v257_v4, %v58_v25 }
   0x8   :  { %v86_v27 = vmax.f32 %v70_v18, 0.0  ;;  %v87_v28 = vmax.f32 %v71_v19, 0.0  ;;  %v88_v31 = vmax.f32 %v72_v22, 0.0  ;;  %v89_v32 = vmax.f32 %v73_v23, 0.0 }
   0x9   :  { %v90_v37 = vmax.f32 %v74_v29, 0.0  ;;  %v91_v38 = vmax.f32 %v75_v30, 0.0  ;;  %v156_v39 = vunpack.c.l.bf16 %v213_v26  ;;  %v92_v42 = vmax.f32 %v76_v33, 0.0 }
   0xa   :  { %v173_v36 = vpack.c.bf16 %v87_v28, %v86_v27  ;;  %v178_v41 = vpack.c.bf16 %v89_v32, %v88_v31  ;;  %v93_v43 = vmax.f32 %v77_v34, 0.0  ;;  %v157_v44 = vunpack.c.h.bf16 %v213_v26 }
   0xb   :  { %v183_v46 = vpack.c.bf16 %v91_v38, %v90_v37  ;;  %v59_v47 = vmul.f32 %v252_v3, %v156_v39  ;;  %v160_v48 = vunpack.c.l.bf16 %v214_v35  ;;  %v161_v49 = vunpack.c.h.bf16 %v214_v35 }
   0xc   :  { %174 = vst [vmem:[%s339_s3] sm:$0xff] %v173_v36   ;;  %v188_v50 = vpack.c.bf16 %v93_v43, %v92_v42  ;;  %v60_v51 = vmul.f32 %v252_v3, %v157_v44  ;;  %v164_v52 = vunpack.c.l.bf16 %v215_v40  ;;  %v165_v53 = vunpack.c.h.bf16 %v215_v40 }
   0xd   :  { %217 = vst [vmem:[%s339_s3 + $0x8] sm:$0xff] %v178_v41   ;;  %v78_v54 = vadd.f32 %v257_v4, %v59_v47  ;;  %v61_v55 = vmul.f32 %v252_v3, %v160_v48  ;;  %v62_v56 = vmul.f32 %v252_v3, %v161_v49  ;;  %v168_v57 = vunpack.c.l.bf16 %v216_v45 }
   0xe   :  { %218 = vst [vmem:[%s339_s3 + $0x10] sm:$0xff] %v183_v46   ;;  %v79_v58 = vadd.f32 %v257_v4, %v60_v51  ;;  %v63_v59 = vmul.f32 %v252_v3, %v164_v52  ;;  %v64_v60 = vmul.f32 %v252_v3, %v165_v53  ;;  %v169_v61 = vunpack.c.h.bf16 %v216_v45 }
   0xf   :  { %219 = vst [vmem:[%s339_s3 + $0x18] sm:$0xff] %v188_v50   ;;  %v94_v62 = vmax.f32 %v78_v54, 0.0  ;;  %v80_v63 = vadd.f32 %v257_v4, %v61_v55  ;;  %v81_v0 = vadd.f32 %v257_v4, %v62_v56  ;;  %v65_v1 = vmul.f32 %v252_v3, %v168_v57 }
  0x10   :  { %v95_v2 = vmax.f32 %v79_v58, 0.0  ;;  %v82_v5 = vadd.f32 %v257_v4, %v63_v59  ;;  %v83_v6 = vadd.f32 %v257_v4, %v64_v60  ;;  %v66_v7 = vmul.f32 %v252_v3, %v169_v61 }
  0x11   :  { %v96_v8 = vmax.f32 %v80_v63, 0.0  ;;  %v97_v9 = vmax.f32 %v81_v0, 0.0  ;;  %v84_v10 = vadd.f32 %v257_v4, %v65_v1 }
  0x12   :  { %v193_v11 = vpack.c.bf16 %v95_v2, %v94_v62  ;;  %v98_v12 = vmax.f32 %v82_v5, 0.0  ;;  %v99_v13 = vmax.f32 %v83_v6, 0.0  ;;  %v85_v14 = vadd.f32 %v257_v4, %v66_v7 }
  0x13   :  { %v198_v15 = vpack.c.bf16 %v97_v9, %v96_v8  ;;  %v100_v16 = vmax.f32 %v84_v10, 0.0 }
  0x14   :  { %220 = vst [vmem:[%s339_s3 + $0x20] sm:$0xff] %v193_v11   ;;  %v203_v17 = vpack.c.bf16 %v99_v13, %v98_v12  ;;  %v101_v18 = vmax.f32 %v85_v14, 0.0 }
  0x15   :  { %221 = vst [vmem:[%s339_s3 + $0x28] sm:$0xff] %v198_v15  }
  0x16   :  { %222 = vst [vmem:[%s339_s3 + $0x30] sm:$0xff] %v203_v17   ;;  %v208_v3 = vpack.c.bf16 %v101_v18, %v100_v16 }
  0x18   :  { %223 = vst [vmem:[%s339_s3 + $0x38] sm:$0xff] %v208_v3  }

// kernel: basic_block_forward.4
= control target key start
LH: loop header
LB: loop body
LE: loop exit
PB: predicated region body
PF: predicated region fallthrough
CT: control target
= control target key end

     0   :  { %s555_s1 = inlined_call_operand.vmem [shape: bf16[128,128], index: 1, kind: input, shape index: {}]   ;;  %s556_s0 = inlined_call_operand.vmem [shape: bf16[128,128], index: 0, kind: input, shape index: {}]   ;;  %s557_s2 = inlined_call_operand.vmem [shape: bf16[128,128], index: 2, kind: output, shape index: {0}]   ;;  %s558_s3 = inlined_call_operand.vmem [shape: f32[1,8,128], index: 3, kind: output, shape index: {1}]   ;;  %s559_s4 = inlined_call_operand.vmem [shape: f32[1,8,128], index: 4, kind: output, shape index: {2}]  }
   0x1   :  { %v374_v0 = vld [vmem:[%s555_s1 + $0x38] sm:$0xff]  ;;  %v373_v1 = vld [vmem:[%s555_s1 + $0x30] sm:$0xff]  ;;  %v372_v2 = vld [vmem:[%s555_s1 + $0x28] sm:$0xff] }
   0x2   :  { %142 = vmatpush.bf16.msra.mxu0 %v374_v0  ;;  %422 = vmatpush.bf16.msra.mxu1 %v374_v0  ;;  %v371_v3 = vld [vmem:[%s555_s1 + $0x20] sm:$0xff]  ;;  %v370_v4 = vld [vmem:[%s555_s1 + $0x18] sm:$0xff]  ;;  %v369_v5 = vld [vmem:[%s555_s1 + $0x10] sm:$0xff] }
   0x3   :  { %423 = vmatpush.bf16.msra.mxu2 %v374_v0  ;;  %424 = vmatpush.bf16.msra.mxu3 %v374_v0  ;;  %v368_v6 = vld [vmem:[%s555_s1 + $0x8] sm:$0xff]  ;;  %v367_v7 = vld [vmem:[%s555_s1] sm:$0xff]  ;;  %v361_v9 = vld [vmem:[%s556_s0 + $0x10] sm:$0xff] }
   0x4   :  { %v359_v8 = vld [vmem:[%s556_s0] sm:$0xff]  ;;  %v365_v11 = vld [vmem:[%s556_s0 + $0x30] sm:$0xff]  ;;  %v360_v12 = vld [vmem:[%s556_s0 + $0x8] sm:$0xff] }
   0x5   :  { %v363_v10 = vld [vmem:[%s556_s0 + $0x20] sm:$0xff]  ;;  %v362_v13 = vld [vmem:[%s556_s0 + $0x18] sm:$0xff]  ;;  %v364_v14 = vld [vmem:[%s556_s0 + $0x28] sm:$0xff] }
   0x6   :  { %143 = vmatpush.bf16.msra.mxu0 %v373_v1  ;;  %425 = vmatpush.bf16.msra.mxu1 %v373_v1  ;;  %v366_v15 = vld [vmem:[%s556_s0 + $0x38] sm:$0xff] }
   0x7   :  { %426 = vmatpush.bf16.msra.mxu2 %v373_v1  ;;  %427 = vmatpush.bf16.msra.mxu3 %v373_v1 }
   0xa   :  { %144 = vmatpush.bf16.msra.mxu0 %v372_v2  ;;  %428 = vmatpush.bf16.msra.mxu1 %v372_v2 }
   0xb   :  { %429 = vmatpush.bf16.msra.mxu2 %v372_v2  ;;  %430 = vmatpush.bf16.msra.mxu3 %v372_v2 }
   0xe   :  { %145 = vmatpush.bf16.msra.mxu0 %v371_v3  ;;  %431 = vmatpush.bf16.msra.mxu1 %v371_v3 }
   0xf   :  { %432 = vmatpush.bf16.msra.mxu2 %v371_v3  ;;  %433 = vmatpush.bf16.msra.mxu3 %v371_v3 }
  0x12   :  { %146 = vmatpush.bf16.msra.mxu0 %v370_v4  ;;  %434 = vmatpush.bf16.msra.mxu1 %v370_v4 }
  0x13   :  { %435 = vmatpush.bf16.msra.mxu2 %v370_v4  ;;  %436 = vmatpush.bf16.msra.mxu3 %v370_v4 }
  0x16   :  { %147 = vmatpush.bf16.msra.mxu0 %v369_v5  ;;  %437 = vmatpush.bf16.msra.mxu1 %v369_v5 }
  0x17   :  { %438 = vmatpush.bf16.msra.mxu2 %v369_v5  ;;  %439 = vmatpush.bf16.msra.mxu3 %v369_v5 }
  0x1a   :  { %148 = vmatpush.bf16.msra.mxu0 %v368_v6  ;;  %440 = vmatpush.bf16.msra.mxu1 %v368_v6 }
  0x1b   :  { %441 = vmatpush.bf16.msra.mxu2 %v368_v6  ;;  %442 = vmatpush.bf16.msra.mxu3 %v368_v6 }
  0x1e   :  { %149 = vmatpush.bf16.msra.mxu0 %v367_v7  ;;  %443 = vmatpush.bf16.msra.mxu1 %v367_v7 }
  0x1f   :  { %444 = vmatpush.bf16.msra.mxu2 %v367_v7  ;;  %445 = vmatpush.bf16.msra.mxu3 %v367_v7 }
  0x21   :  { %150 = vmatmul.bf16.vlgmr.msra.gmra.mxu0 %v359_v8  ;;  %160 = vmatmul.bf16.vlgmr.msra.gmra.mxu1 %v361_v9 }
  0x22   :  { %170 = vmatmul.bf16.vlgmr.msra.gmra.mxu2 %v363_v10  ;;  %180 = vmatmul.bf16.vlgmr.msra.gmra.mxu3 %v365_v11 }
  0x31   :  { %155 = vmatmul.bf16.gmra.mxu0 %v360_v12  ;;  %165 = vmatmul.bf16.gmra.mxu1 %v362_v13 }
  0x32   :  { %175 = vmatmul.bf16.gmra.mxu2 %v364_v14  ;;  %185 = vmatmul.bf16.gmra.mxu3 %v366_v15 }
  0x9e   :  { %v151_v16 = vpop.f32.mrf.mxu0  ;;  %v161_v17 = vpop.f32.mrf.mxu1 }
  0x9f   :  { %v244_v31 = vmul.f32 %v151_v16, %v151_v16  ;;  %v248_v45 = vmul.f32 %v161_v17, %v161_v17 }
  0xa5   :  { %v171_v18 = vpop.f32.mrf.mxu2  ;;  %v519_v19 = vpop.f32.mrf.mxu3 }
  0xa6   :  { %v153_v20 = vpop.f32.mrf.mxu0  ;;  %v163_v21 = vpop.f32.mrf.mxu1  ;;  %v252_v61 = vmul.f32 %v171_v18, %v171_v18  ;;  %v256_v9 = vmul.f32 %v519_v19, %v519_v19 }
  0xa7   :  { %v378_v22 = vpack.c.bf16 %v153_v20, %v151_v16  ;;  %v388_v23 = vpack.c.bf16 %v163_v21, %v161_v17  ;;  %v245_v30 = vmul.f32 %v153_v20, %v153_v20  ;;  %v223_v33 = vadd.f32 %v153_v20, %v151_v16 }
  0xa8   :  { %v249_v48 = vmul.f32 %v163_v21, %v163_v21 }
  0xa9   :  { %379 = vst [vmem:[%s557_s2] sm:$0xff] %v378_v22   ;;  %v260_v34 = vadd.f32 %v245_v30, %v244_v31 }
  0xaa   :  { %416 = vst [vmem:[%s557_s2 + $0x10] sm:$0xff] %v388_v23  }
  0xad   :  { %v173_v24 = vpop.f32.mrf.mxu2  ;;  %v183_v25 = vpop.f32.mrf.mxu3 }
  0xae   :  { %v156_v26 = vpop.f32.mrf.mxu0  ;;  %v166_v27 = vpop.f32.mrf.mxu1  ;;  %v398_v28 = vpack.c.bf16 %v173_v24, %v171_v18  ;;  %v408_v29 = vpack.c.bf16 %v183_v25, %v519_v19  ;;  %v253_v0 = vmul.f32 %v173_v24, %v173_v24  ;;  %v257_v12 = vmul.f32 %v183_v25, %v183_v25 }
  0xaf   :  { %v246_v32 = vmul.f32 %v156_v26, %v156_v26  ;;  %v224_v35 = vadd.f32 %v223_v33, %v156_v26  ;;  %v250_v51 = vmul.f32 %v166_v27, %v166_v27 }
  0xb0   :  { %418 = vst [vmem:[%s557_s2 + $0x20] sm:$0xff] %v398_v28  }
  0xb1   :  { %420 = vst [vmem:[%s557_s2 + $0x30] sm:$0xff] %v408_v29   ;;  %v261_v38 = vadd.f32 %v260_v34, %v246_v32 }
  0xb5   :  { %v176_v36 = vpop.f32.mrf.mxu2  ;;  %v186_v37 = vpop.f32.mrf.mxu3 }
  0xb6   :  { %v158_v39 = vpop.f32.mrf.mxu0  ;;  %v168_v40 = vpop.f32.mrf.mxu1  ;;  %v254_v4 = vmul.f32 %v176_v36, %v176_v36  ;;  %v258_v16 = vmul.f32 %v186_v37, %v186_v37 }
  0xb7   :  { %v383_v41 = vpack.c.bf16 %v158_v39, %v156_v26  ;;  %v225_v42 = vadd.f32 %v224_v35, %v158_v39  ;;  %v247_v43 = vmul.f32 %v158_v39, %v158_v39  ;;  %v393_v44 = vpack.c.bf16 %v168_v40, %v166_v27 }
  0xb8   :  { %v251_v59 = vmul.f32 %v168_v40, %v168_v40 }
  0xb9   :  { %415 = vst [vmem:[%s557_s2 + $0x8] sm:$0xff] %v383_v41   ;;  %v226_v46 = vadd.f32 %v225_v42, %v161_v17  ;;  %v262_v47 = vadd.f32 %v261_v38, %v247_v43 }
  0xba   :  { %417 = vst [vmem:[%s557_s2 + $0x18] sm:$0xff] %v393_v44  }
  0xbb   :  { %v263_v49 = vadd.f32 %v262_v47, %v248_v45  ;;  %v227_v50 = vadd.f32 %v226_v46, %v163_v21 }
  0xbd   :  { %v228_v52 = vadd.f32 %v227_v50, %v166_v27  ;;  %v264_v53 = vadd.f32 %v263_v49, %v249_v48  ;;  %v178_v54 = vpop.f32.mrf.mxu2  ;;  %v188_v55 = vpop.f32.mrf.mxu3 }
  0xbe   :  { %v403_v56 = vpack.c.bf16 %v178_v54, %v176_v36  ;;  %v413_v57 = vpack.c.bf16 %v188_v55, %v186_v37  ;;  %v255_v8 = vmul.f32 %v178_v54, %v178_v54  ;;  %v259_v21 = vmul.f32 %v188_v55, %v188_v55 }
  0xbf   :  { %v229_v58 = vadd.f32 %v228_v52, %v168_v40  ;;  %v265_v60 = vadd.f32 %v264_v53, %v250_v51 }
  0xc0   :  { %419 = vst [vmem:[%s557_s2 + $0x28] sm:$0xff] %v403_v56  }
  0xc1   :  { %v230_v62 = vadd.f32 %v229_v58, %v171_v18  ;;  %v266_v63 = vadd.f32 %v265_v60, %v251_v59  ;;  %421 = vst [vmem:[%s557_s2 + $0x38] sm:$0xff] %v413_v57  }
  0xc3   :  { %v267_v1 = vadd.f32 %v266_v63, %v252_v61  ;;  %v231_v2 = vadd.f32 %v230_v62, %v173_v24 }
  0xc5   :  { %v232_v3 = vadd.f32 %v231_v2, %v176_v36  ;;  %v268_v5 = vadd.f32 %v267_v1, %v253_v0 }
  0xc7   :  { %v269_v6 = vadd.f32 %v268_v5, %v254_v4  ;;  %v233_v7 = vadd.f32 %v232_v3, %v178_v54 }
  0xc9   :  { %v234_v10 = vadd.f32 %v233_v7, %v519_v19  ;;  %v270_v11 = vadd.f32 %v269_v6, %v255_v8 }
  0xcb   :  { %v271_v13 = vadd.f32 %v270_v11, %v256_v9  ;;  %v235_v14 = vadd.f32 %v234_v10, %v183_v25 }
  0xcd   :  { %v236_v15 = vadd.f32 %v235_v14, %v186_v37  ;;  %v272_v17 = vadd.f32 %v271_v13, %v257_v12 }
  0xcf   :  { %v273_v18 = vadd.f32 %v272_v17, %v258_v16  ;;  %v237_v20 = vadd.f32 %v236_v15, %v188_v55 }
  0xd1   :  { %v238_v22 = vrot.slane %v237_v20, 4  ;;  %v274_v23 = vadd.f32 %v273_v18, %v259_v21 }
  0xd3   :  { %v239_v24 = vadd.f32 %v238_v22, %v237_v20  ;;  %v275_v26 = vrot.slane %v274_v23, 4 }
  0xd5   :  { %v240_v27 = vrot.slane %v239_v24, 2  ;;  %v276_v28 = vadd.f32 %v275_v26, %v274_v23 }
  0xd7   :  { %v241_v29 = vadd.f32 %v240_v27, %v239_v24  ;;  %v277_v30 = vrot.slane %v276_v28, 2 }
  0xd9   :  { %v242_v31 = vrot.slane %v241_v29, 1  ;;  %v278_v19 = vadd.f32 %v277_v30, %v276_v28 }
  0xdb   :  { %v243_v32 = vadd.f32 %v242_v31, %v241_v29  ;;  %v279_v33 = vrot.slane %v278_v19, 1 }
  0xdd   :  { %v280_v34 = vadd.f32 %v279_v33, %v278_v19  ;;  %281 = vst [vmem:[%s558_s3] sm:$0xff] %v243_v32 }
  0xdf   :  { %282 = vst [vmem:[%s559_s4] sm:$0xff] %v280_v34 }

// kernel: basic_block_forward.7
= control target key start
LH: loop header
LB: loop body
LE: loop exit
PB: predicated region body
PF: predicated region fallthrough
CT: control target
= control target key end

     0   :  { %s505_s0 = inlined_call_operand.vmem [shape: bf16[128,128], index: 0, kind: input, shape index: {}]   ;;  %s506_s1 = inlined_call_operand.vmem [shape: f32[1,128], index: 1, kind: input, shape index: {}]   ;;  %s507_s2 = inlined_call_operand.vmem [shape: bf16[128,128], index: 2, kind: input, shape index: {}]   ;;  %s508_s3 = inlined_call_operand.vmem [shape: f32[1,128], index: 3, kind: input, shape index: {}]   ;;  %s509_s4 = inlined_call_operand.vmem [shape: f32[1,128], index: 4, kind: input, shape index: {}]   ;;  %s510_s5 = inlined_call_operand.vmem [shape: bf16[128,128], index: 5, kind: output, shape index: {}]  }
   0x1   :  { %v213_v0 = vld [vmem:[%s505_s0] sm:$0xff]   ;;  %v316_v9 = vld [vmem:[%s505_s0 + $0x8] sm:$0xff]   ;;  %v317_v15 = vld [vmem:[%s505_s0 + $0x10] sm:$0xff]  }
   0x2   :  { %v214_v1 = vunpack.c.l.bf16 %v213_v0  ;;  %v215_v2 = vunpack.c.h.bf16 %v213_v0  ;;  %v376_v3 = vld [vmem:[%s506_s1] ss:$0 sm:$0xff]  ;;  %v218_v12 = vunpack.c.l.bf16 %v316_v9  ;;  %v219_v13 = vunpack.c.h.bf16 %v316_v9  ;;  %v323_v14 = vld [vmem:[%s507_s2 + $0x8] sm:$0xff]   ;;  %v324_v24 = vld [vmem:[%s507_s2 + $0x10] sm:$0xff]  }
   0x3   :  { %v381_v4 = vld [vmem:[%s509_s4] ss:$0 sm:$0xff]  ;;  %v250_v18 = vunpack.c.l.bf16 %v323_v14  ;;  %v251_v19 = vunpack.c.h.bf16 %v323_v14  ;;  %v222_v27 = vunpack.c.l.bf16 %v317_v15  ;;  %v223_v28 = vunpack.c.h.bf16 %v317_v15  ;;  %v318_v37 = vld [vmem:[%s505_s0 + $0x18] sm:$0xff]  }
   0x4   :  { %v245_v5 = vld [vmem:[%s507_s2] sm:$0xff]   ;;  %v57_v10 = vmul.f32 %v376_v3, %v214_v1  ;;  %v58_v11 = vmul.f32 %v376_v3, %v215_v2  ;;  %v59_v22 = vmul.f32 %v376_v3, %v218_v12  ;;  %v60_v23 = vmul.f32 %v376_v3, %v219_v13  ;;  %v325_v42 = vld [vmem:[%s507_s2 + $0x18] sm:$0xff]   ;;  %v320_v1 = vld [vmem:[%s505_s0 + $0x28] sm:$0xff]  }
   0x5   :  { %v246_v6 = vunpack.c.l.bf16 %v245_v5  ;;  %v247_v7 = vunpack.c.h.bf16 %v245_v5  ;;  %v389_v8 = vld [vmem:[%s508_s3] ss:$0 sm:$0xff]  ;;  %v61_v33 = vmul.f32 %v376_v3, %v222_v27  ;;  %v62_v34 = vmul.f32 %v376_v3, %v223_v28  ;;  %v327_v13 = vld [vmem:[%s507_s2 + $0x28] sm:$0xff]  }
   0x6   :  { %v76_v20 = vadd.f32 %v381_v4, %v57_v10  ;;  %v77_v21 = vadd.f32 %v381_v4, %v58_v11  ;;  %v130_v25 = vmul.f32 %v389_v8, %v250_v18  ;;  %v131_v26 = vmul.f32 %v389_v8, %v251_v19  ;;  %v319_v47 = vld [vmem:[%s505_s0 + $0x20] sm:$0xff]  }
   0x7   :  { %v128_v16 = vmul.f32 %v389_v8, %v246_v6  ;;  %v129_v17 = vmul.f32 %v389_v8, %v247_v7  ;;  %v78_v31 = vadd.f32 %v381_v4, %v59_v22  ;;  %v79_v32 = vadd.f32 %v381_v4, %v60_v23  ;;  %v326_v60 = vld [vmem:[%s507_s2 + $0x20] sm:$0xff]   ;;  %v321_v22 = vld [vmem:[%s505_s0 + $0x30] sm:$0xff]  }
   0x8   :  { %v254_v35 = vunpack.c.l.bf16 %v324_v24  ;;  %v255_v36 = vunpack.c.h.bf16 %v324_v24  ;;  %v80_v43 = vadd.f32 %v381_v4, %v61_v33  ;;  %v81_v44 = vadd.f32 %v381_v4, %v62_v34 }
   0x9   :  { %v144_v29 = vadd.f32 %v128_v16, %v76_v20  ;;  %v145_v30 = vadd.f32 %v129_v17, %v77_v21  ;;  %v146_v40 = vadd.f32 %v130_v25, %v78_v31  ;;  %v147_v41 = vadd.f32 %v131_v26, %v79_v32 }
   0xa   :  { %v132_v45 = vmul.f32 %v389_v8, %v254_v35  ;;  %v133_v46 = vmul.f32 %v389_v8, %v255_v36  ;;  %v226_v51 = vunpack.c.l.bf16 %v318_v37  ;;  %v227_v54 = vunpack.c.h.bf16 %v318_v37  ;;  %v328_v35 = vld [vmem:[%s507_s2 + $0x30] sm:$0xff]   ;;  %v322_v36 = vld [vmem:[%s505_s0 + $0x38] sm:$0xff]  }
   0xb   :  { %v160_v38 = vmax.f32 %v144_v29, 0.0  ;;  %v161_v39 = vmax.f32 %v145_v30, 0.0  ;;  %v162_v49 = vmax.f32 %v146_v40, 0.0  ;;  %v163_v50 = vmax.f32 %v147_v41, 0.0 }
   0xc   :  { %v148_v52 = vadd.f32 %v132_v45, %v80_v43  ;;  %v149_v53 = vadd.f32 %v133_v46, %v81_v44  ;;  %v258_v55 = vunpack.c.l.bf16 %v325_v42  ;;  %v63_v57 = vmul.f32 %v376_v3, %v226_v51 }
   0xd   :  { %v279_v48 = vpack.c.bf16 %v161_v39, %v160_v38  ;;  %v284_v56 = vpack.c.bf16 %v163_v50, %v162_v49  ;;  %v259_v58 = vunpack.c.h.bf16 %v325_v42  ;;  %v230_v59 = vunpack.c.l.bf16 %v319_v47  ;;  %v329_v49 = vld [vmem:[%s507_s2 + $0x38] sm:$0xff]  }
   0xe   :  { %v164_v61 = vmax.f32 %v148_v52, 0.0  ;;  %v165_v62 = vmax.f32 %v149_v53, 0.0  ;;  %v64_v63 = vmul.f32 %v376_v3, %v227_v54  ;;  %v134_v0 = vmul.f32 %v389_v8, %v258_v55 }
   0xf   :  { %280 = vst [vmem:[%s510_s5] sm:$0xff] %v279_v48   ;;  %v82_v2 = vadd.f32 %v381_v4, %v63_v57  ;;  %v135_v5 = vmul.f32 %v389_v8, %v259_v58  ;;  %v231_v6 = vunpack.c.h.bf16 %v319_v47  ;;  %v65_v7 = vmul.f32 %v376_v3, %v230_v59 }
  0x10   :  { %330 = vst [vmem:[%s510_s5 + $0x8] sm:$0xff] %v284_v56   ;;  %v289_v9 = vpack.c.bf16 %v165_v62, %v164_v61  ;;  %v83_v10 = vadd.f32 %v381_v4, %v64_v63  ;;  %v262_v11 = vunpack.c.l.bf16 %v326_v60  ;;  %v263_v12 = vunpack.c.h.bf16 %v326_v60 }
  0x11   :  { %v150_v14 = vadd.f32 %v134_v0, %v82_v2  ;;  %v66_v15 = vmul.f32 %v376_v3, %v231_v6  ;;  %v84_v16 = vadd.f32 %v381_v4, %v65_v7  ;;  %v234_v17 = vunpack.c.l.bf16 %v320_v1 }
  0x12   :  { %331 = vst [vmem:[%s510_s5 + $0x10] sm:$0xff] %v289_v9   ;;  %v151_v18 = vadd.f32 %v135_v5, %v83_v10  ;;  %v136_v19 = vmul.f32 %v389_v8, %v262_v11  ;;  %v137_v20 = vmul.f32 %v389_v8, %v263_v12  ;;  %v235_v21 = vunpack.c.h.bf16 %v320_v1 }
  0x13   :  { %v166_v23 = vmax.f32 %v150_v14, 0.0  ;;  %v85_v24 = vadd.f32 %v381_v4, %v66_v15  ;;  %v67_v25 = vmul.f32 %v376_v3, %v234_v17  ;;  %v266_v26 = vunpack.c.l.bf16 %v327_v13 }
  0x14   :  { %v167_v27 = vmax.f32 %v151_v18, 0.0  ;;  %v152_v28 = vadd.f32 %v136_v19, %v84_v16  ;;  %v68_v29 = vmul.f32 %v376_v3, %v235_v21  ;;  %v267_v30 = vunpack.c.h.bf16 %v327_v13 }
  0x15   :  { %v153_v31 = vadd.f32 %v137_v20, %v85_v24  ;;  %v86_v32 = vadd.f32 %v381_v4, %v67_v25  ;;  %v138_v33 = vmul.f32 %v389_v8, %v266_v26  ;;  %v238_v34 = vunpack.c.l.bf16 %v321_v22 }
  0x16   :  { %v294_v37 = vpack.c.bf16 %v167_v27, %v166_v23  ;;  %v168_v38 = vmax.f32 %v152_v28, 0.0  ;;  %v87_v39 = vadd.f32 %v381_v4, %v68_v29  ;;  %v139_v40 = vmul.f32 %v389_v8, %v267_v30 }
  0x17   :  { %v169_v41 = vmax.f32 %v153_v31, 0.0  ;;  %v154_v42 = vadd.f32 %v138_v33, %v86_v32  ;;  %v239_v43 = vunpack.c.h.bf16 %v321_v22  ;;  %v69_v44 = vmul.f32 %v376_v3, %v238_v34 }
  0x18   :  { %332 = vst [vmem:[%s510_s5 + $0x18] sm:$0xff] %v294_v37   ;;  %v155_v45 = vadd.f32 %v139_v40, %v87_v39  ;;  %v270_v46 = vunpack.c.l.bf16 %v328_v35  ;;  %v271_v47 = vunpack.c.h.bf16 %v328_v35  ;;  %v242_v48 = vunpack.c.l.bf16 %v322_v36 }
  0x19   :  { %v299_v50 = vpack.c.bf16 %v169_v41, %v168_v38  ;;  %v170_v51 = vmax.f32 %v154_v42, 0.0  ;;  %v70_v52 = vmul.f32 %v376_v3, %v239_v43  ;;  %v88_v53 = vadd.f32 %v381_v4, %v69_v44 }
  0x1a   :  { %v171_v54 = vmax.f32 %v155_v45, 0.0  ;;  %v140_v55 = vmul.f32 %v389_v8, %v270_v46  ;;  %v141_v56 = vmul.f32 %v389_v8, %v271_v47  ;;  %v243_v57 = vunpack.c.h.bf16 %v322_v36 }
  0x1b   :  { %333 = vst [vmem:[%s510_s5 + $0x20] sm:$0xff] %v299_v50   ;;  %v89_v58 = vadd.f32 %v381_v4, %v70_v52  ;;  %v71_v59 = vmul.f32 %v376_v3, %v242_v48  ;;  %v274_v60 = vunpack.c.l.bf16 %v329_v49  ;;  %v275_v61 = vunpack.c.h.bf16 %v329_v49 }
  0x1c   :  { %v304_v62 = vpack.c.bf16 %v171_v54, %v170_v51  ;;  %v156_v63 = vadd.f32 %v140_v55, %v88_v53  ;;  %v72_v0 = vmul.f32 %v376_v3, %v243_v57 }
  0x1d   :  { %v157_v1 = vadd.f32 %v141_v56, %v89_v58  ;;  %v90_v2 = vadd.f32 %v381_v4, %v71_v59  ;;  %v142_v5 = vmul.f32 %v389_v8, %v274_v60  ;;  %v143_v6 = vmul.f32 %v389_v8, %v275_v61 }
  0x1e   :  { %334 = vst [vmem:[%s510_s5 + $0x28] sm:$0xff] %v304_v62   ;;  %v172_v7 = vmax.f32 %v156_v63, 0.0  ;;  %v91_v9 = vadd.f32 %v381_v4, %v72_v0 }
  0x1f   :  { %v173_v10 = vmax.f32 %v157_v1, 0.0  ;;  %v158_v11 = vadd.f32 %v142_v5, %v90_v2 }
  0x20   :  { %v159_v12 = vadd.f32 %v143_v6, %v91_v9 }
  0x21   :  { %v309_v13 = vpack.c.bf16 %v173_v10, %v172_v7  ;;  %v174_v14 = vmax.f32 %v158_v11, 0.0 }
  0x22   :  { %v175_v3 = vmax.f32 %v159_v12, 0.0 }
  0x23   :  { %335 = vst [vmem:[%s510_s5 + $0x30] sm:$0xff] %v309_v13  }
  0x24   :  { %v314_v15 = vpack.c.bf16 %v175_v3, %v174_v14 }
  0x26   :  { %336 = vst [vmem:[%s510_s5 + $0x38] sm:$0xff] %v314_v15  }

// kernel: basic_block_forward.6
= control target key start
LH: loop header
LB: loop body
LE: loop exit
PB: predicated region body
PF: predicated region fallthrough
CT: control target
= control target key end

     0   :  { %s1133_s1 = inlined_call_operand.vmem [shape: bf16[128,128], index: 1, kind: input, shape index: {}]   ;;  %s1134_s3 = inlined_call_operand.vmem [shape: bf16[128,128], index: 3, kind: input, shape index: {}]   ;;  %s1135_s0 = inlined_call_operand.vmem [shape: bf16[128,128], index: 0, kind: input, shape index: {}]   ;;  %s1136_s2 = inlined_call_operand.vmem [shape: bf16[128,128], index: 2, kind: input, shape index: {}]   ;;  %s1137_s4 = inlined_call_operand.vmem [shape: bf16[128,128], index: 4, kind: output, shape index: {0}]   ;;  %s1138_s7 = inlined_call_operand.vmem [shape: bf16[128,128], index: 7, kind: output, shape index: {3}]   ;;  %s1139_s5 = inlined_call_operand.vmem [shape: f32[1,8,128], index: 5, kind: output, shape index: {1}]   ;;  %s1140_s8 = inlined_call_operand.vmem [shape: f32[1,8,128], index: 8, kind: output, shape index: {4}]   ;;  %s1141_s6 = inlined_call_operand.vmem [shape: f32[1,8,128], index: 6, kind: output, shape index: {2}]   ;;  %s1142_s9 = inlined_call_operand.vmem [shape: f32[1,8,128], index: 9, kind: output, shape index: {5}]  }
   0x1   :  { %v728_v0 = vld [vmem:[%s1133_s1 + $0x38] sm:$0xff]  ;;  %v727_v2 = vld [vmem:[%s1133_s1 + $0x30] sm:$0xff]  ;;  %v726_v4 = vld [vmem:[%s1133_s1 + $0x28] sm:$0xff] }
   0x2   :  { %v744_v1 = vld [vmem:[%s1134_s3 + $0x38] sm:$0xff]  ;;  %151 = vmatpush.bf16.msra.mxu0 %v728_v0  ;;  %v743_v3 = vld [vmem:[%s1134_s3 + $0x30] sm:$0xff]  ;;  %839 = vmatpush.bf16.msra.mxu2 %v728_v0  ;;  %v742_v5 = vld [vmem:[%s1134_s3 + $0x28] sm:$0xff] }
   0x3   :  { %420 = vmatpush.bf16.msra.mxu1 %v744_v1  ;;  %847 = vmatpush.bf16.msra.mxu3 %v744_v1  ;;  %v725_v6 = vld [vmem:[%s1133_s1 + $0x20] sm:$0xff]  ;;  %v724_v8 = vld [vmem:[%s1133_s1 + $0x18] sm:$0xff]  ;;  %v723_v10 = vld [vmem:[%s1133_s1 + $0x10] sm:$0xff] }
   0x4   :  { %v741_v7 = vld [vmem:[%s1134_s3 + $0x20] sm:$0xff]  ;;  %v740_v9 = vld [vmem:[%s1134_s3 + $0x18] sm:$0xff]  ;;  %v739_v11 = vld [vmem:[%s1134_s3 + $0x10] sm:$0xff] }
   0x5   :  { %v722_v12 = vld [vmem:[%s1133_s1 + $0x8] sm:$0xff]  ;;  %v721_v14 = vld [vmem:[%s1133_s1] sm:$0xff]  ;;  %v715_v24 = vld [vmem:[%s1135_s0 + $0x10] sm:$0xff] }
   0x6   :  { %152 = vmatpush.bf16.msra.mxu0 %v727_v2  ;;  %840 = vmatpush.bf16.msra.mxu2 %v727_v2  ;;  %v738_v13 = vld [vmem:[%s1134_s3 + $0x8] sm:$0xff]  ;;  %v737_v15 = vld [vmem:[%s1134_s3] sm:$0xff]  ;;  %v731_v25 = vld [vmem:[%s1136_s2 + $0x10] sm:$0xff] }
   0x7   :  { %421 = vmatpush.bf16.msra.mxu1 %v743_v3  ;;  %848 = vmatpush.bf16.msra.mxu3 %v743_v3  ;;  %v713_v16 = vld [vmem:[%s1135_s0] sm:$0xff]  ;;  %v714_v20 = vld [vmem:[%s1135_s0 + $0x8] sm:$0xff]  ;;  %v719_v26 = vld [vmem:[%s1135_s0 + $0x30] sm:$0xff] }
   0x8   :  { %v729_v17 = vld [vmem:[%s1136_s2] sm:$0xff]  ;;  %v730_v21 = vld [vmem:[%s1136_s2 + $0x8] sm:$0xff]  ;;  %v735_v27 = vld [vmem:[%s1136_s2 + $0x30] sm:$0xff] }
   0x9   :  { %v717_v18 = vld [vmem:[%s1135_s0 + $0x20] sm:$0xff]  ;;  %v718_v22 = vld [vmem:[%s1135_s0 + $0x28] sm:$0xff]  ;;  %v716_v28 = vld [vmem:[%s1135_s0 + $0x18] sm:$0xff] }
   0xa   :  { %153 = vmatpush.bf16.msra.mxu0 %v726_v4  ;;  %841 = vmatpush.bf16.msra.mxu2 %v726_v4  ;;  %v733_v19 = vld [vmem:[%s1136_s2 + $0x20] sm:$0xff]  ;;  %v734_v23 = vld [vmem:[%s1136_s2 + $0x28] sm:$0xff]  ;;  %v732_v29 = vld [vmem:[%s1136_s2 + $0x18] sm:$0xff] }
   0xb   :  { %422 = vmatpush.bf16.msra.mxu1 %v742_v5  ;;  %849 = vmatpush.bf16.msra.mxu3 %v742_v5  ;;  %v720_v30 = vld [vmem:[%s1135_s0 + $0x38] sm:$0xff] }
   0xc   :  { %v736_v31 = vld [vmem:[%s1136_s2 + $0x38] sm:$0xff] }
   0xe   :  { %154 = vmatpush.bf16.msra.mxu0 %v725_v6  ;;  %842 = vmatpush.bf16.msra.mxu2 %v725_v6 }
   0xf   :  { %423 = vmatpush.bf16.msra.mxu1 %v741_v7  ;;  %850 = vmatpush.bf16.msra.mxu3 %v741_v7 }
  0x12   :  { %155 = vmatpush.bf16.msra.mxu0 %v724_v8  ;;  %843 = vmatpush.bf16.msra.mxu2 %v724_v8 }
  0x13   :  { %424 = vmatpush.bf16.msra.mxu1 %v740_v9  ;;  %851 = vmatpush.bf16.msra.mxu3 %v740_v9 }
  0x16   :  { %156 = vmatpush.bf16.msra.mxu0 %v723_v10  ;;  %844 = vmatpush.bf16.msra.mxu2 %v723_v10 }
  0x17   :  { %425 = vmatpush.bf16.msra.mxu1 %v739_v11  ;;  %852 = vmatpush.bf16.msra.mxu3 %v739_v11 }
  0x1a   :  { %157 = vmatpush.bf16.msra.mxu0 %v722_v12  ;;  %845 = vmatpush.bf16.msra.mxu2 %v722_v12 }
  0x1b   :  { %426 = vmatpush.bf16.msra.mxu1 %v738_v13  ;;  %853 = vmatpush.bf16.msra.mxu3 %v738_v13 }
  0x1e   :  { %158 = vmatpush.bf16.msra.mxu0 %v721_v14  ;;  %846 = vmatpush.bf16.msra.mxu2 %v721_v14 }
  0x1f   :  { %427 = vmatpush.bf16.msra.mxu1 %v737_v15  ;;  %854 = vmatpush.bf16.msra.mxu3 %v737_v15 }
  0x21   :  { %159 = vmatmul.bf16.vlgmr.msra.gmra.mxu0 %v713_v16  ;;  %179 = vmatmul.bf16.vlgmr.msra.gmra.mxu2 %v717_v18 }
  0x22   :  { %428 = vmatmul.bf16.vlgmr.msra.gmra.mxu1 %v729_v17  ;;  %448 = vmatmul.bf16.vlgmr.msra.gmra.mxu3 %v733_v19 }
  0x31   :  { %164 = vmatmul.bf16.gmra.mxu0 %v714_v20  ;;  %184 = vmatmul.bf16.gmra.mxu2 %v718_v22 }
  0x32   :  { %433 = vmatmul.bf16.gmra.mxu1 %v730_v21  ;;  %453 = vmatmul.bf16.gmra.mxu3 %v734_v23 }
  0x41   :  { %169 = vmatmul.bf16.gmra.mxu0 %v715_v24  ;;  %189 = vmatmul.bf16.gmra.mxu2 %v719_v26 }
  0x42   :  { %438 = vmatmul.bf16.gmra.mxu1 %v731_v25  ;;  %458 = vmatmul.bf16.gmra.mxu3 %v735_v27 }
  0x51   :  { %174 = vmatmul.bf16.gmra.mxu0 %v716_v28  ;;  %194 = vmatmul.bf16.gmra.mxu2 %v720_v30 }
  0x52   :  { %443 = vmatmul.bf16.gmra.mxu1 %v732_v29  ;;  %463 = vmatmul.bf16.gmra.mxu3 %v736_v31 }
  0x9e   :  { %v160_v32 = vpop.f32.mrf.mxu0 }
  0x9f   :  { %v429_v33 = vpop.f32.mrf.mxu1  ;;  %v253_v2 = vmul.f32 %v160_v32, %v160_v32 }
  0xa0   :  { %v522_v4 = vmul.f32 %v429_v33, %v429_v33 }
  0xa4   :  { %v1001_v34 = vpop.f32.mrf.mxu2 }
  0xa5   :  { %v1003_v35 = vpop.f32.mrf.mxu3 }
  0xa6   :  { %v162_v36 = vpop.f32.mrf.mxu0 }
  0xa7   :  { %v431_v37 = vpop.f32.mrf.mxu1  ;;  %v748_v38 = vpack.c.bf16 %v162_v36, %v160_v32  ;;  %v254_v0 = vmul.f32 %v162_v36, %v162_v36  ;;  %v232_v5 = vadd.f32 %v162_v36, %v160_v32 }
  0xa8   :  { %v788_v39 = vpack.c.bf16 %v431_v37, %v429_v33  ;;  %v523_v1 = vmul.f32 %v431_v37, %v431_v37  ;;  %v501_v6 = vadd.f32 %v431_v37, %v429_v33 }
  0xa9   :  { %749 = vst [vmem:[%s1137_s4] sm:$0xff] %v748_v38   ;;  %v269_v8 = vadd.f32 %v254_v0, %v253_v2 }
  0xaa   :  { %789 = vst [vmem:[%s1138_s7] sm:$0xff] %v788_v39   ;;  %v538_v10 = vadd.f32 %v523_v1, %v522_v4 }
  0xac   :  { %v1011_v40 = vpop.f32.mrf.mxu2 }
  0xad   :  { %v1013_v41 = vpop.f32.mrf.mxu3  ;;  %v768_v43 = vpack.c.bf16 %v1011_v40, %v1001_v34 }
  0xae   :  { %v165_v42 = vpop.f32.mrf.mxu0  ;;  %v808_v45 = vpack.c.bf16 %v1013_v41, %v1003_v35 }
  0xaf   :  { %v434_v44 = vpop.f32.mrf.mxu1  ;;  %828 = vst [vmem:[%s1137_s4 + $0x20] sm:$0xff] %v768_v43   ;;  %v255_v3 = vmul.f32 %v165_v42, %v165_v42  ;;  %v233_v11 = vadd.f32 %v232_v5, %v165_v42 }
  0xb0   :  { %835 = vst [vmem:[%s1138_s7 + $0x20] sm:$0xff] %v808_v45   ;;  %v524_v7 = vmul.f32 %v434_v44, %v434_v44  ;;  %v502_v12 = vadd.f32 %v501_v6, %v434_v44  ;;  %v262_v6 = vmul.f32 %v1011_v40, %v1011_v40 }
  0xb1   :  { %v270_v16 = vadd.f32 %v269_v8, %v255_v3  ;;  %v530_v3 = vmul.f32 %v1003_v35, %v1003_v35 }
  0xb2   :  { %v539_v22 = vadd.f32 %v538_v10, %v524_v7 }
  0xb4   :  { %v1025_v46 = vpop.f32.mrf.mxu2 }
  0xb5   :  { %v1027_v47 = vpop.f32.mrf.mxu3 }
  0xb6   :  { %v167_v48 = vpop.f32.mrf.mxu0 }
  0xb7   :  { %v436_v49 = vpop.f32.mrf.mxu1  ;;  %v753_v50 = vpack.c.bf16 %v167_v48, %v165_v42  ;;  %v256_v9 = vmul.f32 %v167_v48, %v167_v48  ;;  %v234_v23 = vadd.f32 %v233_v11, %v167_v48  ;;  %v263_v11 = vmul.f32 %v1025_v46, %v1025_v46 }
  0xb8   :  { %v793_v51 = vpack.c.bf16 %v436_v49, %v434_v44  ;;  %v525_v13 = vmul.f32 %v436_v49, %v436_v49  ;;  %v503_v25 = vadd.f32 %v502_v12, %v436_v49 }
  0xb9   :  { %825 = vst [vmem:[%s1137_s4 + $0x8] sm:$0xff] %v753_v50   ;;  %v271_v24 = vadd.f32 %v270_v16, %v256_v9 }
  0xba   :  { %832 = vst [vmem:[%s1138_s7 + $0x8] sm:$0xff] %v793_v51   ;;  %v540_v28 = vadd.f32 %v539_v22, %v525_v13 }
  0xbc   :  { %v1035_v52 = vpop.f32.mrf.mxu2 }
  0xbd   :  { %v1037_v53 = vpop.f32.mrf.mxu3  ;;  %v773_v55 = vpack.c.bf16 %v1035_v52, %v1025_v46 }
  0xbe   :  { %v170_v54 = vpop.f32.mrf.mxu0  ;;  %v813_v57 = vpack.c.bf16 %v1037_v53, %v1027_v47 }
  0xbf   :  { %v439_v56 = vpop.f32.mrf.mxu1  ;;  %829 = vst [vmem:[%s1137_s4 + $0x28] sm:$0xff] %v773_v55   ;;  %v257_v17 = vmul.f32 %v170_v54, %v170_v54  ;;  %v235_v29 = vadd.f32 %v234_v23, %v170_v54 }
  0xc0   :  { %836 = vst [vmem:[%s1138_s7 + $0x28] sm:$0xff] %v813_v57   ;;  %v526_v26 = vmul.f32 %v439_v56, %v439_v56  ;;  %v504_v31 = vadd.f32 %v503_v25, %v439_v56 }
  0xc1   :  { %v272_v30 = vadd.f32 %v271_v24, %v257_v17  ;;  %v532_v17 = vmul.f32 %v1027_v47, %v1027_v47 }
  0xc2   :  { %v541_v37 = vadd.f32 %v540_v28, %v526_v26 }
  0xc4   :  { %v1049_v58 = vpop.f32.mrf.mxu2 }
  0xc5   :  { %v1051_v59 = vpop.f32.mrf.mxu3 }
  0xc6   :  { %v172_v60 = vpop.f32.mrf.mxu0 }
  0xc7   :  { %v441_v61 = vpop.f32.mrf.mxu1  ;;  %v758_v62 = vpack.c.bf16 %v172_v60, %v170_v54  ;;  %v258_v27 = vmul.f32 %v172_v60, %v172_v60  ;;  %v236_v36 = vadd.f32 %v235_v29, %v172_v60  ;;  %v261_v60 = vmul.f32 %v1001_v34, %v1001_v34 }
  0xc8   :  { %v798_v63 = vpack.c.bf16 %v441_v61, %v439_v56  ;;  %v527_v32 = vmul.f32 %v441_v61, %v441_v61  ;;  %v505_v39 = vadd.f32 %v504_v31, %v441_v61 }
  0xc9   :  { %826 = vst [vmem:[%s1137_s4 + $0x10] sm:$0xff] %v758_v62   ;;  %v273_v38 = vadd.f32 %v272_v30, %v258_v27 }
  0xca   :  { %833 = vst [vmem:[%s1138_s7 + $0x10] sm:$0xff] %v798_v63   ;;  %v542_v48 = vadd.f32 %v541_v37, %v527_v32 }
  0xcc   :  { %v1059_v14 = vpop.f32.mrf.mxu2 }
  0xcd   :  { %v1061_v15 = vpop.f32.mrf.mxu3  ;;  %v778_v19 = vpack.c.bf16 %v1059_v14, %v1049_v58  ;;  %v266_v28 = vmul.f32 %v1059_v14, %v1059_v14 }
  0xce   :  { %v175_v18 = vpop.f32.mrf.mxu0  ;;  %v818_v21 = vpack.c.bf16 %v1061_v15, %v1051_v59 }
  0xcf   :  { %v444_v20 = vpop.f32.mrf.mxu1  ;;  %830 = vst [vmem:[%s1137_s4 + $0x30] sm:$0xff] %v778_v19   ;;  %v259_v33 = vmul.f32 %v175_v18, %v175_v18  ;;  %v237_v43 = vadd.f32 %v236_v36, %v175_v18 }
  0xd0   :  { %837 = vst [vmem:[%s1138_s7 + $0x30] sm:$0xff] %v818_v21   ;;  %v528_v42 = vmul.f32 %v444_v20, %v444_v20  ;;  %v506_v50 = vadd.f32 %v505_v39, %v444_v20 }
  0xd1   :  { %v274_v49 = vadd.f32 %v273_v38, %v259_v33 }
  0xd2   :  { %v543_v56 = vadd.f32 %v542_v48, %v528_v42 }
  0xd4   :  { %v195_v44 = vpop.f32.mrf.mxu2 }
  0xd5   :  { %v464_v45 = vpop.f32.mrf.mxu3  ;;  %v267_v36 = vmul.f32 %v195_v44, %v195_v44 }
  0xd6   :  { %v177_v51 = vpop.f32.mrf.mxu0  ;;  %v536_v39 = vmul.f32 %v464_v45, %v464_v45 }
  0xd7   :  { %v446_v54 = vpop.f32.mrf.mxu1  ;;  %v763_v55 = vpack.c.bf16 %v177_v51, %v175_v18  ;;  %v238_v57 = vadd.f32 %v237_v43, %v177_v51  ;;  %v260_v62 = vmul.f32 %v177_v51, %v177_v51 }
  0xd8   :  { %v803_v63 = vpack.c.bf16 %v446_v54, %v444_v20  ;;  %v507_v0 = vadd.f32 %v506_v50, %v446_v54  ;;  %v529_v1 = vmul.f32 %v446_v54, %v446_v54  ;;  %v264_v20 = vmul.f32 %v1035_v52, %v1035_v52 }
  0xd9   :  { %827 = vst [vmem:[%s1137_s4 + $0x18] sm:$0xff] %v763_v55   ;;  %v239_v61 = vadd.f32 %v238_v57, %v1001_v34  ;;  %v275_v2 = vadd.f32 %v274_v49, %v260_v62  ;;  %v531_v34 = vmul.f32 %v1013_v41, %v1013_v41 }
  0xda   :  { %834 = vst [vmem:[%s1138_s7 + $0x18] sm:$0xff] %v803_v63   ;;  %v508_v4 = vadd.f32 %v507_v0, %v1003_v35  ;;  %v544_v5 = vadd.f32 %v543_v56, %v529_v1 }
  0xdb   :  { %v240_v7 = vadd.f32 %v239_v61, %v1011_v40  ;;  %v276_v8 = vadd.f32 %v275_v2, %v261_v60 }
  0xdc   :  { %v509_v9 = vadd.f32 %v508_v4, %v1013_v41  ;;  %v545_v10 = vadd.f32 %v544_v5, %v530_v3  ;;  %v197_v35 = vpop.f32.mrf.mxu2 }
  0xdd   :  { %v241_v12 = vadd.f32 %v240_v7, %v1025_v46  ;;  %v277_v13 = vadd.f32 %v276_v8, %v262_v6  ;;  %v466_v16 = vpop.f32.mrf.mxu3  ;;  %v783_v19 = vpack.c.bf16 %v197_v35, %v195_v44  ;;  %v533_v46 = vmul.f32 %v1037_v53, %v1037_v53 }
  0xde   :  { %v510_v40 = vadd.f32 %v509_v9, %v1027_v47  ;;  %v546_v18 = vadd.f32 %v545_v10, %v531_v34  ;;  %v823_v22 = vpack.c.bf16 %v466_v16, %v464_v45  ;;  %v265_v47 = vmul.f32 %v1049_v58, %v1049_v58 }
  0xdf   :  { %v278_v41 = vadd.f32 %v277_v13, %v263_v11  ;;  %v242_v21 = vadd.f32 %v241_v12, %v1035_v52  ;;  %831 = vst [vmem:[%s1137_s4 + $0x38] sm:$0xff] %v783_v19   ;;  %v534_v52 = vmul.f32 %v1051_v59, %v1051_v59  ;;  %v268_v48 = vmul.f32 %v197_v35, %v197_v35 }
  0xe0   :  { %v547_v23 = vadd.f32 %v546_v18, %v532_v17  ;;  %v511_v24 = vadd.f32 %v510_v40, %v1037_v53  ;;  %838 = vst [vmem:[%s1138_s7 + $0x38] sm:$0xff] %v823_v22   ;;  %v537_v51 = vmul.f32 %v466_v16, %v466_v16 }
  0xe1   :  { %v243_v25 = vadd.f32 %v242_v21, %v1049_v58  ;;  %v279_v26 = vadd.f32 %v278_v41, %v264_v20  ;;  %v535_v58 = vmul.f32 %v1061_v15, %v1061_v15 }
  0xe2   :  { %v512_v27 = vadd.f32 %v511_v24, %v1051_v59  ;;  %v548_v53 = vadd.f32 %v547_v23, %v533_v46 }
  0xe3   :  { %v244_v29 = vadd.f32 %v243_v25, %v1059_v14  ;;  %v280_v30 = vadd.f32 %v279_v26, %v265_v47 }
  0xe4   :  { %v513_v31 = vadd.f32 %v512_v27, %v1061_v15  ;;  %v549_v32 = vadd.f32 %v548_v53, %v534_v52 }
  0xe5   :  { %v245_v33 = vadd.f32 %v244_v29, %v195_v44  ;;  %v281_v37 = vadd.f32 %v280_v30, %v266_v28 }
  0xe6   :  { %v514_v38 = vadd.f32 %v513_v31, %v464_v45  ;;  %v550_v42 = vadd.f32 %v549_v32, %v535_v58 }
  0xe7   :  { %v282_v59 = vadd.f32 %v281_v37, %v267_v36  ;;  %v246_v43 = vadd.f32 %v245_v33, %v197_v35 }
  0xe8   :  { %v551_v49 = vadd.f32 %v550_v42, %v536_v39  ;;  %v515_v50 = vadd.f32 %v514_v38, %v466_v16 }
  0xe9   :  { %v247_v14 = vrot.slane %v246_v43, 4  ;;  %v283_v54 = vadd.f32 %v282_v59, %v268_v48 }
  0xea   :  { %v516_v55 = vrot.slane %v515_v50, 4  ;;  %v552_v57 = vadd.f32 %v551_v49, %v537_v51 }
  0xeb   :  { %v248_v62 = vadd.f32 %v247_v14, %v246_v43  ;;  %v284_v63 = vrot.slane %v283_v54, 4 }
  0xec   :  { %v517_v15 = vadd.f32 %v516_v55, %v515_v50  ;;  %v553_v56 = vrot.slane %v552_v57, 4 }
  0xed   :  { %v249_v0 = vrot.slane %v248_v62, 2  ;;  %v285_v44 = vadd.f32 %v284_v63, %v283_v54 }
  0xee   :  { %v518_v1 = vrot.slane %v517_v15, 2  ;;  %v554_v60 = vadd.f32 %v553_v56, %v552_v57 }
  0xef   :  { %v250_v45 = vadd.f32 %v249_v0, %v248_v62  ;;  %v286_v61 = vrot.slane %v285_v44, 2 }
  0xf0   :  { %v519_v2 = vadd.f32 %v518_v1, %v517_v15  ;;  %v555_v3 = vrot.slane %v554_v60, 2 }
  0xf1   :  { %v251_v4 = vrot.slane %v250_v45, 1  ;;  %v287_v5 = vadd.f32 %v286_v61, %v285_v44 }
  0xf2   :  { %v520_v6 = vrot.slane %v519_v2, 1  ;;  %v556_v7 = vadd.f32 %v555_v3, %v554_v60 }
  0xf3   :  { %v252_v8 = vadd.f32 %v251_v4, %v250_v45  ;;  %v288_v34 = vrot.slane %v287_v5, 1 }
  0xf4   :  { %v521_v9 = vadd.f32 %v520_v6, %v519_v2  ;;  %v557_v10 = vrot.slane %v556_v7, 1 }
  0xf5   :  { %v289_v11 = vadd.f32 %v288_v34, %v287_v5  ;;  %290 = vst [vmem:[%s1139_s5] sm:$0xff] %v252_v8 }
  0xf6   :  { %v558_v12 = vadd.f32 %v557_v10, %v556_v7  ;;  %559 = vst [vmem:[%s1140_s8] sm:$0xff] %v521_v9 }
  0xf7   :  { %291 = vst [vmem:[%s1141_s6] sm:$0xff] %v289_v11 }
  0xf8   :  { %560 = vst [vmem:[%s1142_s9] sm:$0xff] %v558_v12 }

</bundles_post_ra>
